<compile_context>
chip_gen: v7x
topology: tpu7x:2x2x1
jax: 0.10.0
libtpu: 0.0.40
codegen_flags: <defaults>
</compile_context>

<pallas_src>
import functools

import jax
import jax.numpy as jnp
from jax.experimental import pallas as pl
from jax.experimental.pallas import tpu as pltpu

IMAGE_SIZE = 3 * 28 * 28   # 2352
H_DIM = 20
Z_DIM = 20
MULV_LANES = 128           # [mu | log_var | zero-pad] -> lane-dense output


def _round_up(x, m):
    return ((x + m - 1) // m) * m


def _vae_kernel(x_ref, eps_ref,
                w1_ref, b1_ref, w2_ref, b2_ref, w34_ref, b34_ref,
                w5_ref, b5_ref, w6_ref, b6_ref,
                xr_ref, mulv_ref):
    # x arrives as f32; cast to bf16 only at the MXU input.  All dots accumulate in
    # f32 (preferred_element_type), elementwise math stays f32.
    x = x_ref[...].astype(jnp.bfloat16)

    # ---- encode ----
    h1 = jnp.maximum(
        jnp.dot(x, w1_ref[...], preferred_element_type=jnp.float32) + b1_ref[...], 0.0)
    h2 = jnp.maximum(
        jnp.dot(h1.astype(jnp.bfloat16), w2_ref[...],
                preferred_element_type=jnp.float32) + b2_ref[...], 0.0)

    # fused fc3|fc4 (lane-padded to 128): columns [0:Z) = mu, [Z:2Z) = log_var, rest 0.
    mulv = (jnp.dot(h2.astype(jnp.bfloat16), w34_ref[...],
                    preferred_element_type=jnp.float32) + b34_ref[...])
    mu = mulv[:, :Z_DIM]
    log_var = mulv[:, Z_DIM:2 * Z_DIM]

    # ---- reparameterize: z = mu + eps * exp(log_var / 2) ----
    z = mu + eps_ref[...] * jnp.exp(log_var * 0.5)

    # ---- decode ----
    h = jnp.maximum(
        jnp.dot(z.astype(jnp.bfloat16), w5_ref[...],
                preferred_element_type=jnp.float32) + b5_ref[...], 0.0)
    logits = (jnp.dot(h.astype(jnp.bfloat16), w6_ref[...],
                      preferred_element_type=jnp.float32) + b6_ref[...])

    # sigmoid(x) == 0.5 * (tanh(0.5 * x) + 1): single EUP transcendental; store bf16.
    xr_ref[...] = (0.5 * (jnp.tanh(0.5 * logits) + 1.0)).astype(xr_ref.dtype)
    mulv_ref[...] = mulv


def pack_params(params):
    """One-time packing (call at init, NOT per forward): bf16 weights, fc3|fc4 fused
    and zero-padded to MULV_LANES columns, biases kept f32 as (1, out) rows."""
    (w1, b1), (w2, b2), (w3, b3), (w4, b4), (w5, b5), (w6, b6) = params
    w34 = jnp.concatenate([w3, w4], axis=1)          # (H_DIM, 2*Z_DIM)
    b34 = jnp.concatenate([b3, b4], axis=1)          # (1, 2*Z_DIM)
    pad = MULV_LANES - w34.shape[1]
    w34 = jnp.pad(w34, ((0, 0), (0, pad)))
    b34 = jnp.pad(b34, ((0, 0), (0, pad)))
    bf16 = lambda w: w.astype(jnp.bfloat16)
    return (bf16(w1), b1, bf16(w2), b2, bf16(w34), b34, bf16(w5), b5, bf16(w6), b6)


@functools.partial(jax.jit, static_argnames=("block_b", "reconst_dtype"))
def vae_forward(x, eps, packed_params, *, block_b=512, reconst_dtype=jnp.bfloat16):
    """x: (B, IMAGE_SIZE) f32, eps: (B, Z_DIM) f32, packed_params from pack_params().

    Returns (x_reconst [reconst_dtype], mu [f32], log_var [f32]).
    block_b must be a multiple of 16.
    """
    assert block_b % 16 == 0
    B = x.shape[0]
    Bp16 = _round_up(B, 16)
    # >=2 grid steps when B > 16 so the 'parallel' batch axis can span both v7x cores;
    # tiles are multiples of 16 (bf16 sublane packing) and capped at block_b.
    if Bp16 <= 16:
        n_steps = 1
    else:
        n_steps = max(2, pl.cdiv(Bp16, block_b))
    TB = _round_up(pl.cdiv(Bp16, n_steps), 16)
    Bp = TB * n_steps
    if Bp != B:
        x = jnp.pad(x, ((0, Bp - B), (0, 0)))
        eps = jnp.pad(eps, ((0, Bp - B), (0, 0)))

    # Batched tensors follow the grid; weights/biases use a constant index_map so they
    # stay resident in VMEM across all grid steps.
    batched = lambda feat: pl.BlockSpec((TB, feat), lambda i: (i, 0))
    resident = lambda shape: pl.BlockSpec(shape, lambda i: (0, 0))

    in_specs = [
        batched(IMAGE_SIZE),                     # x (f32, cast to bf16 in-kernel)
        batched(Z_DIM),                          # eps (f32)
        resident((IMAGE_SIZE, H_DIM)),           # w1
        resident((1, H_DIM)),                    # b1
        resident((H_DIM, H_DIM)),                # w2
        resident((1, H_DIM)),                    # b2
        resident((H_DIM, MULV_LANES)),           # w34 (padded)
        resident((1, MULV_LANES)),               # b34 (padded)
        resident((Z_DIM, H_DIM)),                # w5
        resident((1, H_DIM)),                    # b5
        resident((H_DIM, IMAGE_SIZE)),           # w6
        resident((1, IMAGE_SIZE)),               # b6
    ]
    out_specs = (batched(IMAGE_SIZE), batched(MULV_LANES))
    out_shapes = (
        jax.ShapeDtypeStruct((Bp, IMAGE_SIZE), jnp.bfloat16),    # x_reconst (bf16)
        jax.ShapeDtypeStruct((Bp, MULV_LANES), jnp.float32),     # [mu | log_var | pad]
    )

    flops = 2 * Bp * (IMAGE_SIZE * H_DIM + H_DIM * H_DIM + H_DIM * MULV_LANES
                      + Z_DIM * H_DIM + H_DIM * IMAGE_SIZE)
    weight_bytes = 2 * (IMAGE_SIZE * H_DIM + H_DIM * H_DIM + H_DIM * MULV_LANES
                        + Z_DIM * H_DIM + H_DIM * IMAGE_SIZE)           # bf16
    bias_bytes = 4 * (3 * H_DIM + MULV_LANES + IMAGE_SIZE)              # f32
    io_bytes = (4 * Bp * IMAGE_SIZE            # x f32 in
                + 4 * Bp * Z_DIM               # eps f32 in
                + 2 * Bp * IMAGE_SIZE          # xr bf16 out
                + 4 * Bp * MULV_LANES)         # mu|logvar f32 out
    cost = pl.CostEstimate(
        flops=flops,
        transcendentals=Bp * (IMAGE_SIZE + Z_DIM),   # tanh + exp
        bytes_accessed=weight_bytes + bias_bytes + io_bytes,
    )

    xr, mulv = pl.pallas_call(
        _vae_kernel,
        grid=(n_steps,),
        in_specs=in_specs,
        out_specs=out_specs,
        out_shape=out_shapes,
        compiler_params=pltpu.CompilerParams(
            dimension_semantics=("parallel",),
            vmem_limit_bytes=48 * 1024 * 1024,
        ),
        cost_estimate=cost,
    )(x, eps, *packed_params)

    x_reconst = xr[:B]
    if reconst_dtype != jnp.bfloat16:
        x_reconst = x_reconst.astype(reconst_dtype)
    mu = mulv[:B, :Z_DIM]
    log_var = mulv[:B, Z_DIM:2 * Z_DIM]
    return x_reconst, mu, log_var


def init_params(key):
    """Deterministic PyTorch-style Linear init: U(-1/sqrt(fan_in), 1/sqrt(fan_in))."""
    layer_dims = [
        (IMAGE_SIZE, H_DIM),  # fc1
        (H_DIM, H_DIM),       # fc2
        (H_DIM, Z_DIM),       # fc3
        (H_DIM, Z_DIM),       # fc4
        (Z_DIM, H_DIM),       # fc5
        (H_DIM, IMAGE_SIZE),  # fc6
    ]
    params = []
    for fan_in, fan_out in layer_dims:
        key, kw, kb = jax.random.split(key, 3)
        bound = 1.0 / float(fan_in) ** 0.5
        w = jax.random.uniform(kw, (fan_in, fan_out), jnp.float32, -bound, bound)
        b = jax.random.uniform(kb, (1, fan_out), jnp.float32, -bound, bound)
        params.append((w, b))
    return params


def reference_forward_matched(x, eps, params):
    """Pure-JAX reference with the SAME mixed precision as the kernel (bf16 dots, f32 math)."""
    def dot(a, w):
        return jnp.dot(a.astype(jnp.bfloat16), w.astype(jnp.bfloat16),
                       preferred_element_type=jnp.float32)
    (w1, b1), (w2, b2), (w3, b3), (w4, b4), (w5, b5), (w6, b6) = params
    h1 = jnp.maximum(dot(x, w1) + b1, 0.0)
    h2 = jnp.maximum(dot(h1, w2) + b2, 0.0)
    mu = dot(h2, w3) + b3
    log_var = dot(h2, w4) + b4
    z = mu + eps * jnp.exp(log_var * 0.5)
    h = jnp.maximum(dot(z, w5) + b5, 0.0)
    logits = dot(h, w6) + b6
    xr = 0.5 * (jnp.tanh(0.5 * logits) + 1.0)
    return xr, mu, log_var


def reference_forward_f32(x, eps, params):
    """Full-f32 reference matching the original PyTorch module semantics."""
    (w1, b1), (w2, b2), (w3, b3), (w4, b4), (w5, b5), (w6, b6) = params
    h1 = jnp.maximum(x @ w1 + b1, 0.0)
    h2 = jnp.maximum(h1 @ w2 + b2, 0.0)
    mu = h2 @ w3 + b3
    log_var = h2 @ w4 + b4
    z = mu + eps * jnp.exp(log_var * 0.5)
    h = jnp.maximum(z @ w5 + b5, 0.0)
    xr = jax.nn.sigmoid(h @ w6 + b6)
    return xr, mu, log_var


if __name__ == "__main__":
    key = jax.random.PRNGKey(0)
    key, kx, keps, kparams = jax.random.split(key, 4)

    B = 8
    x = jax.random.uniform(kx, (B, IMAGE_SIZE), jnp.float32)    # "flattened images"
    # torch.randn_like(std) noise is sampled host-side and passed into the kernel
    eps = jax.random.normal(keps, (B, Z_DIM), jnp.float32)
    params = init_params(kparams)
    packed = pack_params(params)   # one-time packing, outside the per-call path

    x_reconst, mu, log_var = jax.block_until_ready(vae_forward(x, eps, packed))

    assert x_reconst.shape == (B, IMAGE_SIZE) and x_reconst.dtype == jnp.bfloat16
    assert mu.shape == (B, Z_DIM) and log_var.shape == (B, Z_DIM)

    # Check against a precision-matched pure-JAX reference (x_reconst is bf16 now, so
    # its tolerance reflects bf16 output quantization; mu/log_var stay tight f32).
    xr_m, mu_m, lv_m = reference_forward_matched(x, eps, params)
    assert jnp.allclose(x_reconst.astype(jnp.float32), xr_m, atol=1e-2, rtol=1e-2)
    assert jnp.allclose(mu, mu_m, atol=1e-4, rtol=1e-4)
    assert jnp.allclose(log_var, lv_m, atol=1e-4, rtol=1e-4)

    # Loose check against the full-f32 PyTorch-equivalent reference (bf16 slack).
    xr_f, mu_f, lv_f = reference_forward_f32(x, eps, params)
    assert jnp.allclose(x_reconst.astype(jnp.float32), xr_f, atol=5e-2, rtol=5e-2)
    assert jnp.allclose(mu, mu_f, atol=5e-2, rtol=5e-2)
    assert jnp.allclose(log_var, lv_f, atol=5e-2, rtol=5e-2)

    print("KERNEL_OK")
</pallas_src>

<mosaic_0001>
module attributes {stable_mosaic.version = 11 : i64} {
  func.func @_vae_kernel(%arg0: i32, %arg1: memref<16x2352xf32, #tpu.memory_space<vmem>>, %arg2: memref<16x20xf32, #tpu.memory_space<vmem>>, %arg3: memref<2352x20xbf16, #tpu.memory_space<vmem>>, %arg4: memref<1x20xf32, #tpu.memory_space<vmem>>, %arg5: memref<20x20xbf16, #tpu.memory_space<vmem>>, %arg6: memref<1x20xf32, #tpu.memory_space<vmem>>, %arg7: memref<20x128xbf16, #tpu.memory_space<vmem>>, %arg8: memref<1x128xf32, #tpu.memory_space<vmem>>, %arg9: memref<20x20xbf16, #tpu.memory_space<vmem>>, %arg10: memref<1x20xf32, #tpu.memory_space<vmem>>, %arg11: memref<20x2352xbf16, #tpu.memory_space<vmem>>, %arg12: memref<1x2352xf32, #tpu.memory_space<vmem>>, %arg13: memref<16x2352xbf16, #tpu.memory_space<vmem>>, %arg14: memref<16x128xf32, #tpu.memory_space<vmem>>) attributes {dimension_semantics = [#tpu.dimension_semantics<parallel>], iteration_bounds = array<i64: 1>, scalar_prefetch = 0 : i64, scratch_operands = 0 : i64, tpu.core_type = #tpu.core_type<tc>, window_params = [{transform_indices = @transform_0, window_bounds = array<i64: 16, 2352>}, {transform_indices = @transform_1, window_bounds = array<i64: 16, 20>}, {pipeline_mode = #tpu.pipeline_mode<synchronous>, transform_indices = @transform_2, window_bounds = array<i64: 2352, 20>}, {pipeline_mode = #tpu.pipeline_mode<synchronous>, transform_indices = @transform_3, window_bounds = array<i64: 1, 20>}, {pipeline_mode = #tpu.pipeline_mode<synchronous>, transform_indices = @transform_4, window_bounds = array<i64: 20, 20>}, {pipeline_mode = #tpu.pipeline_mode<synchronous>, transform_indices = @transform_5, window_bounds = array<i64: 1, 20>}, {pipeline_mode = #tpu.pipeline_mode<synchronous>, transform_indices = @transform_6, window_bounds = array<i64: 20, 128>}, {pipeline_mode = #tpu.pipeline_mode<synchronous>, transform_indices = @transform_7, window_bounds = array<i64: 1, 128>}, {pipeline_mode = #tpu.pipeline_mode<synchronous>, transform_indices = @transform_8, window_bounds = array<i64: 20, 20>}, {pipeline_mode = #tpu.pipeline_mode<synchronous>, transform_indices = @transform_9, window_bounds = array<i64: 1, 20>}, {pipeline_mode = #tpu.pipeline_mode<synchronous>, transform_indices = @transform_10, window_bounds = array<i64: 20, 2352>}, {pipeline_mode = #tpu.pipeline_mode<synchronous>, transform_indices = @transform_11, window_bounds = array<i64: 1, 2352>}, {transform_indices = @transform_12, window_bounds = array<i64: 16, 2352>}, {transform_indices = @transform_13, window_bounds = array<i64: 16, 128>}]} {
    %c0 = arith.constant 0 : index
    %c0_0 = arith.constant 0 : index
    %0 = vector.load %arg1[%c0, %c0_0] : memref<16x2352xf32, #tpu.memory_space<vmem>>, vector<16x2352xf32>
    %1 = arith.truncf %0 : vector<16x2352xf32> to vector<16x2352xbf16>
    %c0_1 = arith.constant 0 : index
    %c0_2 = arith.constant 0 : index
    %2 = vector.load %arg3[%c0_1, %c0_2] : memref<2352x20xbf16, #tpu.memory_space<vmem>>, vector<2352x20xbf16>
    %cst = arith.constant dense<0.000000e+00> : vector<16x20xf32>
    %3 = tpu.matmul %1, %2, %cst {dimension_numbers = #tpu.dot_dimension_numbers<[1], [0], [0], [1], [0, 0, 1, 1], [], []>} : vector<16x2352xbf16>, vector<2352x20xbf16>, vector<16x20xf32> -> vector<16x20xf32>
    %c0_3 = arith.constant 0 : index
    %c0_4 = arith.constant 0 : index
    %4 = vector.load %arg4[%c0_3, %c0_4] : memref<1x20xf32, #tpu.memory_space<vmem>>, vector<1x20xf32>
    %5 = vector.broadcast %4 : vector<1x20xf32> to vector<16x20xf32>
    %6 = arith.addf %3, %5 : vector<16x20xf32>
    %cst_5 = arith.constant 0.000000e+00 : f32
    %7 = vector.broadcast %cst_5 : f32 to vector<16x20xf32>
    %8 = arith.maximumf %6, %7 : vector<16x20xf32>
    %9 = arith.truncf %8 : vector<16x20xf32> to vector<16x20xbf16>
    %c0_6 = arith.constant 0 : index
    %c0_7 = arith.constant 0 : index
    %10 = vector.load %arg5[%c0_6, %c0_7] : memref<20x20xbf16, #tpu.memory_space<vmem>>, vector<20x20xbf16>
    %cst_8 = arith.constant dense<0.000000e+00> : vector<16x20xf32>
    %11 = tpu.matmul %9, %10, %cst_8 {dimension_numbers = #tpu.dot_dimension_numbers<[1], [0], [0], [1], [0, 0, 1, 1], [], []>} : vector<16x20xbf16>, vector<20x20xbf16>, vector<16x20xf32> -> vector<16x20xf32>
    %c0_9 = arith.constant 0 : index
    %c0_10 = arith.constant 0 : index
    %12 = vector.load %arg6[%c0_9, %c0_10] : memref<1x20xf32, #tpu.memory_space<vmem>>, vector<1x20xf32>
    %13 = vector.broadcast %12 : vector<1x20xf32> to vector<16x20xf32>
    %14 = arith.addf %11, %13 : vector<16x20xf32>
    %cst_11 = arith.constant 0.000000e+00 : f32
    %15 = vector.broadcast %cst_11 : f32 to vector<16x20xf32>
    %16 = arith.maximumf %14, %15 : vector<16x20xf32>
    %17 = arith.truncf %16 : vector<16x20xf32> to vector<16x20xbf16>
    %c0_12 = arith.constant 0 : index
    %c0_13 = arith.constant 0 : index
    %18 = vector.load %arg7[%c0_12, %c0_13] : memref<20x128xbf16, #tpu.memory_space<vmem>>, vector<20x128xbf16>
    %cst_14 = arith.constant dense<0.000000e+00> : vector<16x128xf32>
    %19 = tpu.matmul %17, %18, %cst_14 {dimension_numbers = #tpu.dot_dimension_numbers<[1], [0], [0], [1], [0, 0, 1, 1], [], []>} : vector<16x20xbf16>, vector<20x128xbf16>, vector<16x128xf32> -> vector<16x128xf32>
    %c0_15 = arith.constant 0 : index
    %c0_16 = arith.constant 0 : index
    %20 = vector.load %arg8[%c0_15, %c0_16] : memref<1x128xf32, #tpu.memory_space<vmem>>, vector<1x128xf32>
    %21 = vector.broadcast %20 : vector<1x128xf32> to vector<16x128xf32>
    %22 = arith.addf %19, %21 : vector<16x128xf32>
    %23 = vector.extract_strided_slice %22 {offsets = [0, 0], sizes = [16, 20], strides = [1, 1]} : vector<16x128xf32> to vector<16x20xf32>
    %24 = vector.extract_strided_slice %22 {offsets = [0, 20], sizes = [16, 20], strides = [1, 1]} : vector<16x128xf32> to vector<16x20xf32>
    %c0_17 = arith.constant 0 : index
    %c0_18 = arith.constant 0 : index
    %25 = vector.load %arg2[%c0_17, %c0_18] : memref<16x20xf32, #tpu.memory_space<vmem>>, vector<16x20xf32>
    %cst_19 = arith.constant 5.000000e-01 : f32
    %26 = vector.broadcast %cst_19 : f32 to vector<16x20xf32>
    %27 = arith.mulf %24, %26 : vector<16x20xf32>
    %28 = math.exp %27 : vector<16x20xf32>
    %29 = arith.mulf %25, %28 : vector<16x20xf32>
    %30 = arith.addf %23, %29 : vector<16x20xf32>
    %31 = arith.truncf %30 : vector<16x20xf32> to vector<16x20xbf16>
    %c0_20 = arith.constant 0 : index
    %c0_21 = arith.constant 0 : index
    %32 = vector.load %arg9[%c0_20, %c0_21] : memref<20x20xbf16, #tpu.memory_space<vmem>>, vector<20x20xbf16>
    %cst_22 = arith.constant dense<0.000000e+00> : vector<16x20xf32>
    %33 = tpu.matmul %31, %32, %cst_22 {dimension_numbers = #tpu.dot_dimension_numbers<[1], [0], [0], [1], [0, 0, 1, 1], [], []>} : vector<16x20xbf16>, vector<20x20xbf16>, vector<16x20xf32> -> vector<16x20xf32>
    %c0_23 = arith.constant 0 : index
    %c0_24 = arith.constant 0 : index
    %34 = vector.load %arg10[%c0_23, %c0_24] : memref<1x20xf32, #tpu.memory_space<vmem>>, vector<1x20xf32>
    %35 = vector.broadcast %34 : vector<1x20xf32> to vector<16x20xf32>
    %36 = arith.addf %33, %35 : vector<16x20xf32>
    %cst_25 = arith.constant 0.000000e+00 : f32
    %37 = vector.broadcast %cst_25 : f32 to vector<16x20xf32>
    %38 = arith.maximumf %36, %37 : vector<16x20xf32>
    %39 = arith.truncf %38 : vector<16x20xf32> to vector<16x20xbf16>
    %c0_26 = arith.constant 0 : index
    %c0_27 = arith.constant 0 : index
    %40 = vector.load %arg11[%c0_26, %c0_27] : memref<20x2352xbf16, #tpu.memory_space<vmem>>, vector<20x2352xbf16>
    %cst_28 = arith.constant dense<0.000000e+00> : vector<16x2352xf32>
    %41 = tpu.matmul %39, %40, %cst_28 {dimension_numbers = #tpu.dot_dimension_numbers<[1], [0], [0], [1], [0, 0, 1, 1], [], []>} : vector<16x20xbf16>, vector<20x2352xbf16>, vector<16x2352xf32> -> vector<16x2352xf32>
    %c0_29 = arith.constant 0 : index
    %c0_30 = arith.constant 0 : index
    %42 = vector.load %arg12[%c0_29, %c0_30] : memref<1x2352xf32, #tpu.memory_space<vmem>>, vector<1x2352xf32>
    %43 = vector.broadcast %42 : vector<1x2352xf32> to vector<16x2352xf32>
    %44 = arith.addf %41, %43 : vector<16x2352xf32>
    %cst_31 = arith.constant 5.000000e-01 : f32
    %45 = vector.broadcast %cst_31 : f32 to vector<16x2352xf32>
    %46 = arith.mulf %45, %44 : vector<16x2352xf32>
    %47 = math.tanh %46 : vector<16x2352xf32>
    %cst_32 = arith.constant 1.000000e+00 : f32
    %48 = vector.broadcast %cst_32 : f32 to vector<16x2352xf32>
    %49 = arith.addf %47, %48 : vector<16x2352xf32>
    %cst_33 = arith.constant 5.000000e-01 : f32
    %50 = vector.broadcast %cst_33 : f32 to vector<16x2352xf32>
    %51 = arith.mulf %50, %49 : vector<16x2352xf32>
    %52 = arith.truncf %51 : vector<16x2352xf32> to vector<16x2352xbf16>
    %c0_34 = arith.constant 0 : index
    %c0_35 = arith.constant 0 : index
    %53 = vector.load %arg13[%c0_34, %c0_35] : memref<16x2352xbf16, #tpu.memory_space<vmem>>, vector<16x2352xbf16>
    tpu.vector_store %arg13[%c0_34, %c0_35], %52 {strides = array<i32>} : memref<16x2352xbf16, #tpu.memory_space<vmem>>, vector<16x2352xbf16>,
    %c0_36 = arith.constant 0 : index
    %c0_37 = arith.constant 0 : index
    %54 = vector.load %arg14[%c0_36, %c0_37] : memref<16x128xf32, #tpu.memory_space<vmem>>, vector<16x128xf32>
    tpu.vector_store %arg14[%c0_36, %c0_37], %22 {strides = array<i32>} : memref<16x128xf32, #tpu.memory_space<vmem>>, vector<16x128xf32>,
    return
  }
  func.func @transform_0(%arg0: i32) -> (i32, i32) {
    %c0_i32 = arith.constant 0 : i32
    %c0_i32_0 = arith.constant 0 : i32
    return %arg0, %c0_i32 : i32, i32
  }
  func.func @transform_1(%arg0: i32) -> (i32, i32) {
    %c0_i32 = arith.constant 0 : i32
    %c0_i32_0 = arith.constant 0 : i32
    return %arg0, %c0_i32 : i32, i32
  }
  func.func @transform_2(%arg0: i32) -> (i32, i32) {
    %c0_i32 = arith.constant 0 : i32
    %c0_i32_0 = arith.constant 0 : i32
    %c0_i32_1 = arith.constant 0 : i32
    return %c0_i32, %c0_i32_0 : i32, i32
  }
  func.func @transform_3(%arg0: i32) -> (i32, i32) {
    %c0_i32 = arith.constant 0 : i32
    %c0_i32_0 = arith.constant 0 : i32
    %c0_i32_1 = arith.constant 0 : i32
    return %c0_i32, %c0_i32_0 : i32, i32
  }
  func.func @transform_4(%arg0: i32) -> (i32, i32) {
    %c0_i32 = arith.constant 0 : i32
    %c0_i32_0 = arith.constant 0 : i32
    %c0_i32_1 = arith.constant 0 : i32
    return %c0_i32, %c0_i32_0 : i32, i32
  }
  func.func @transform_5(%arg0: i32) -> (i32, i32) {
    %c0_i32 = arith.constant 0 : i32
    %c0_i32_0 = arith.constant 0 : i32
    %c0_i32_1 = arith.constant 0 : i32
    return %c0_i32, %c0_i32_0 : i32, i32
  }
  func.func @transform_6(%arg0: i32) -> (i32, i32) {
    %c0_i32 = arith.constant 0 : i32
    %c0_i32_0 = arith.constant 0 : i32
    %c0_i32_1 = arith.constant 0 : i32
    return %c0_i32, %c0_i32_0 : i32, i32
  }
  func.func @transform_7(%arg0: i32) -> (i32, i32) {
    %c0_i32 = arith.constant 0 : i32
    %c0_i32_0 = arith.constant 0 : i32
    %c0_i32_1 = arith.constant 0 : i32
    return %c0_i32, %c0_i32_0 : i32, i32
  }
  func.func @transform_8(%arg0: i32) -> (i32, i32) {
    %c0_i32 = arith.constant 0 : i32
    %c0_i32_0 = arith.constant 0 : i32
    %c0_i32_1 = arith.constant 0 : i32
    return %c0_i32, %c0_i32_0 : i32, i32
  }
  func.func @transform_9(%arg0: i32) -> (i32, i32) {
    %c0_i32 = arith.constant 0 : i32
    %c0_i32_0 = arith.constant 0 : i32
    %c0_i32_1 = arith.constant 0 : i32
    return %c0_i32, %c0_i32_0 : i32, i32
  }
  func.func @transform_10(%arg0: i32) -> (i32, i32) {
    %c0_i32 = arith.constant 0 : i32
    %c0_i32_0 = arith.constant 0 : i32
    %c0_i32_1 = arith.constant 0 : i32
    return %c0_i32, %c0_i32_0 : i32, i32
  }
  func.func @transform_11(%arg0: i32) -> (i32, i32) {
    %c0_i32 = arith.constant 0 : i32
    %c0_i32_0 = arith.constant 0 : i32
    %c0_i32_1 = arith.constant 0 : i32
    return %c0_i32, %c0_i32_0 : i32, i32
  }
  func.func @transform_12(%arg0: i32) -> (i32, i32) {
    %c0_i32 = arith.constant 0 : i32
    %c0_i32_0 = arith.constant 0 : i32
    return %arg0, %c0_i32 : i32, i32
  }
  func.func @transform_13(%arg0: i32) -> (i32, i32) {
    %c0_i32 = arith.constant 0 : i32
    %c0_i32_0 = arith.constant 0 : i32
    return %arg0, %c0_i32 : i32, i32
  }
}

</mosaic_0001>

<bundles_post_ra>
// kernel: vae_forward.1
= control target key start
LH: loop header
LB: loop body
LE: loop exit
PB: predicated region body
PF: predicated region fallthrough
CT: control target
= control target key end

     0   :  { %vm3789_vm0 = vmmov 0   ;;  %vm1284_vm1 = vcmask 392192   ;;  %vm1724_vm2 = vcmask 1041408   ;;  %vm1720_vm3 = vcmask 162816   ;;  %s3790_s19 = smov 108   ;;  %s4778_s2 = inlined_call_operand.vmem [shape: bf16[2352,20], index: 2, kind: input, shape index: {}]   ;;  %s4779_s0 = inlined_call_operand.vmem [shape: f32[16,2352], index: 0, kind: input, shape index: {}]   ;;  %s4780_s3 = inlined_call_operand.vmem [shape: f32[1,20], index: 3, kind: input, shape index: {}]   ;;  %s4781_s4 = inlined_call_operand.vmem [shape: bf16[20,20], index: 4, kind: input, shape index: {}]   ;;  %s4782_s6 = inlined_call_operand.vmem [shape: bf16[20,128], index: 6, kind: input, shape index: {}]   ;;  %s4783_s5 = inlined_call_operand.vmem [shape: f32[1,20], index: 5, kind: input, shape index: {}]   ;;  %s4784_s7 = inlined_call_operand.vmem [shape: f32[1,128], index: 7, kind: input, shape index: {}]   ;;  %s4785_s13 = inlined_call_operand.vmem [shape: f32[16,128], index: 13, kind: output, shape index: {1}]   ;;  %s4786_s8 = inlined_call_operand.vmem [shape: bf16[20,20], index: 8, kind: input, shape index: {}]   ;;  %s4787_s1 = inlined_call_operand.vmem [shape: f32[16,20], index: 1, kind: input, shape index: {}]   ;;  %s4788_s10 = inlined_call_operand.vmem [shape: bf16[20,2352], index: 10, kind: input, shape index: {}]   ;;  %s4789_s9 = inlined_call_operand.vmem [shape: f32[1,20], index: 9, kind: input, shape index: {}]   ;;  %s4790_s11 = inlined_call_operand.vmem [shape: f32[1,2352], index: 11, kind: input, shape index: {}]   ;;  %s4791_s12 = inlined_call_operand.vmem [shape: bf16[16,2352], index: 12, kind: output, shape index: {0}]  }
   0x1   :  { %v3508_v0 = vld [vmem:[%s4778_s2 + $0x40] sm:$0xff]   ;;  %v3512_v4 = vld [vmem:[%s4778_s2 + $0x48] sm:$0xff]   ;;  %v3516_v8 = vld [vmem:[%s4778_s2 + $0x50] sm:$0xff]   ;;  %vm2968_vm4 = vcmask 388096  }
   0x2   :  { %v3509_v1 = vld [vmem:[%s4778_s2] sm:$0xff]   ;;  %3248 = vmatprep.subr.bf16.mxu0 %v3508_v0  ;;  %v3513_v5 = vld [vmem:[%s4778_s2 + $0x8] sm:$0xff]   ;;  %v3517_v9 = vld [vmem:[%s4778_s2 + $0x10] sm:$0xff]  }
   0x3   :  { %v3510_v2 = vld [vmem:[%s4778_s2 + $0xc0] sm:$0xff]   ;;  %3249 = vmatpush3.bf16.msra.mxu0 %v3509_v1  ;;  %v3514_v6 = vld [vmem:[%s4778_s2 + $0xc8] sm:$0xff]   ;;  %v3518_v10 = vld [vmem:[%s4778_s2 + $0xd0] sm:$0xff]  }
   0x4   :  { %v3511_v3 = vld [vmem:[%s4778_s2 + $0x80] sm:$0xff]   ;;  %3270 = vmatprep.subr.bf16.mxu1 %v3510_v2  ;;  %3250 = vmatprep.subr.bf16.mxu0 %v3512_v4  ;;  %v3515_v7 = vld [vmem:[%s4778_s2 + $0x88] sm:$0xff]   ;;  %v3519_v11 = vld [vmem:[%s4778_s2 + $0x90] sm:$0xff]  }
   0x5   :  { %3271 = vmatpush3.bf16.msra.mxu1 %v3511_v3  ;;  %v3520_v12 = vld [vmem:[%s4778_s2 + $0x58] sm:$0xff]   ;;  %v3524_v16 = vld [vmem:[%s4778_s2 + $0x60] sm:$0xff]   ;;  %v3528_v20 = vld [vmem:[%s4778_s2 + $0x68] sm:$0xff]  }
   0x6   :  { %3272 = vmatprep.subr.bf16.mxu1 %v3514_v6  ;;  %v3521_v13 = vld [vmem:[%s4778_s2 + $0x18] sm:$0xff]   ;;  %v3525_v17 = vld [vmem:[%s4778_s2 + $0x20] sm:$0xff]   ;;  %v3529_v21 = vld [vmem:[%s4778_s2 + $0x28] sm:$0xff]  }
   0x7   :  { %3251 = vmatpush3.bf16.msra.mxu0 %v3513_v5  ;;  %v3522_v14 = vld [vmem:[%s4778_s2 + $0xd8] sm:$0xff]   ;;  %v3526_v18 = vld [vmem:[%s4778_s2 + $0xe0] sm:$0xff]   ;;  %v3530_v22 = vld [vmem:[%s4778_s2 + $0xe8] sm:$0xff]  }
   0x8   :  { %3252 = vmatprep.subr.bf16.mxu0 %v3516_v8  ;;  %v3523_v15 = vld [vmem:[%s4778_s2 + $0x98] sm:$0xff]   ;;  %v3527_v19 = vld [vmem:[%s4778_s2 + $0xa0] sm:$0xff]   ;;  %v3531_v23 = vld [vmem:[%s4778_s2 + $0xa8] sm:$0xff]  }
   0x9   :  { %3273 = vmatpush3.bf16.msra.mxu1 %v3515_v7  ;;  %v3532_v24 = vld [vmem:[%s4778_s2 + $0x70] sm:$0xff]   ;;  %v3536_v28 = vld [vmem:[%s4778_s2 + $0x78] sm:$0xff]   ;;  %v45_v31 = vld [vmem:[%s4779_s0 + $0x8] sm:$0xff] }
   0xa   :  { %3274 = vmatprep.subr.bf16.mxu1 %v3518_v10  ;;  %v3533_v25 = vld [vmem:[%s4778_s2 + $0x30] sm:$0xff]   ;;  %v3537_v29 = vld [vmem:[%s4778_s2 + $0x38] sm:$0xff]   ;;  %v64_v32 = vld [vmem:[%s4779_s0 + $0xa0] sm:$0xff] }
   0xb   :  { %3253 = vmatpush3.bf16.msra.mxu0 %v3517_v9  ;;  %v3534_v26 = vld [vmem:[%s4778_s2 + $0xf0] sm:$0xff]   ;;  %v3538_v30 = vld [vmem:[%s4778_s2 + $0xf8] sm:$0xff]   ;;  %v83_v33 = vpack.c.bf16 %v64_v32, %v45_v31  ;;  %v44_v35 = vld [vmem:[%s4779_s0] sm:$0xff] }
   0xc   :  { %3254 = vmatprep.subr.bf16.mxu0 %v3520_v12  ;;  %v3535_v27 = vld [vmem:[%s4778_s2 + $0xb0] sm:$0xff]   ;;  %v3539_v34 = vld [vmem:[%s4778_s2 + $0xb8] sm:$0xff]   ;;  %v3540_v38 = vld [vmem:[%s4778_s2 + $0x140] sm:$0xff]  }
   0xd   :  { %3275 = vmatpush3.bf16.msra.mxu1 %v3519_v11  ;;  %v63_v36 = vld [vmem:[%s4779_s0 + $0x98] sm:$0xff]  ;;  %1320 = vmatprep.mubr.bf16.mxu0 %v83_v33  ;;  %v66_v40 = vld [vmem:[%s4779_s0 + $0xb0] sm:$0xff]  ;;  %v3541_v42 = vld [vmem:[%s4778_s2 + $0x100] sm:$0xff]  }
   0xe   :  { %3276 = vmatprep.subr.bf16.mxu1 %v3522_v14  ;;  %v82_v37 = vpack.c.bf16 %v63_v36, %v44_v35  ;;  %v47_v39 = vld [vmem:[%s4779_s0 + $0x18] sm:$0xff]  ;;  %v46_v43 = vld [vmem:[%s4779_s0 + $0x10] sm:$0xff]  ;;  %v65_v44 = vld [vmem:[%s4779_s0 + $0xa8] sm:$0xff] }
   0xf   :  { %3255 = vmatpush3.bf16.msra.mxu0 %v3521_v13  ;;  %v85_v41 = vpack.c.bf16 %v66_v40, %v47_v39  ;;  %v84_v45 = vpack.c.bf16 %v65_v44, %v46_v43  ;;  %v3542_v46 = vld [vmem:[%s4778_s2 + $0x1c0] sm:$0xff]   ;;  %v3544_v48 = vld [vmem:[%s4778_s2 + $0x148] sm:$0xff]   ;;  %v3548_v52 = vld [vmem:[%s4778_s2 + $0x150] sm:$0xff]  }
  0x10   :  { %3256 = vmatprep.subr.bf16.mxu0 %v3524_v16  ;;  %v3543_v47 = vld [vmem:[%s4778_s2 + $0x180] sm:$0xff]   ;;  %v3545_v49 = vld [vmem:[%s4778_s2 + $0x108] sm:$0xff]   ;;  %v3549_v53 = vld [vmem:[%s4778_s2 + $0x110] sm:$0xff]  }
  0x11   :  { %3277 = vmatpush3.bf16.msra.mxu1 %v3523_v15  ;;  %1361 = vmatprep.mubr.bf16.mxu1 %v85_v41  ;;  %v3546_v50 = vld [vmem:[%s4778_s2 + $0x1c8] sm:$0xff]   ;;  %v3550_v54 = vld [vmem:[%s4778_s2 + $0x1d0] sm:$0xff]   ;;  %v3552_v56 = vld [vmem:[%s4778_s2 + $0x158] sm:$0xff]  }
  0x12   :  { %3278 = vmatprep.subr.bf16.mxu1 %v3526_v18  ;;  %v3547_v51 = vld [vmem:[%s4778_s2 + $0x188] sm:$0xff]   ;;  %v3551_v55 = vld [vmem:[%s4778_s2 + $0x190] sm:$0xff]   ;;  %v3553_v57 = vld [vmem:[%s4778_s2 + $0x118] sm:$0xff]  }
  0x13   :  { %3257 = vmatpush3.bf16.msra.mxu0 %v3525_v17  ;;  %v3554_v58 = vld [vmem:[%s4778_s2 + $0x1d8] sm:$0xff]   ;;  %v3556_v60 = vld [vmem:[%s4778_s2 + $0x160] sm:$0xff]   ;;  %v3560_v0 = vld [vmem:[%s4778_s2 + $0x168] sm:$0xff]  }
  0x14   :  { %3258 = vmatprep.subr.bf16.mxu0 %v3528_v20  ;;  %v3555_v59 = vld [vmem:[%s4778_s2 + $0x198] sm:$0xff]   ;;  %v3557_v61 = vld [vmem:[%s4778_s2 + $0x120] sm:$0xff]   ;;  %v3561_v1 = vld [vmem:[%s4778_s2 + $0x128] sm:$0xff]  }
  0x15   :  { %3279 = vmatpush3.bf16.msra.mxu1 %v3527_v19  ;;  %v3558_v62 = vld [vmem:[%s4778_s2 + $0x1e0] sm:$0xff]   ;;  %v3562_v2 = vld [vmem:[%s4778_s2 + $0x1e8] sm:$0xff]   ;;  %v3564_v4 = vld [vmem:[%s4778_s2 + $0x170] sm:$0xff]  }
  0x16   :  { %3280 = vmatprep.subr.bf16.mxu1 %v3530_v22  ;;  %v3559_v63 = vld [vmem:[%s4778_s2 + $0x1a0] sm:$0xff]   ;;  %v3563_v3 = vld [vmem:[%s4778_s2 + $0x1a8] sm:$0xff]   ;;  %v3565_v5 = vld [vmem:[%s4778_s2 + $0x130] sm:$0xff]  }
  0x17   :  { %3259 = vmatpush3.bf16.msra.mxu0 %v3529_v21  ;;  %v3566_v6 = vld [vmem:[%s4778_s2 + $0x1f0] sm:$0xff]   ;;  %v3568_v8 = vld [vmem:[%s4778_s2 + $0x178] sm:$0xff]   ;;  %v49_v11 = vld [vmem:[%s4779_s0 + $0x28] sm:$0xff] }
  0x18   :  { %3260 = vmatprep.subr.bf16.mxu0 %v3532_v24  ;;  %v3567_v7 = vld [vmem:[%s4778_s2 + $0x1b0] sm:$0xff]   ;;  %v3569_v9 = vld [vmem:[%s4778_s2 + $0x138] sm:$0xff]   ;;  %v68_v12 = vld [vmem:[%s4779_s0 + $0xc0] sm:$0xff] }
  0x19   :  { %3281 = vmatpush3.bf16.msra.mxu1 %v3531_v23  ;;  %v3570_v10 = vld [vmem:[%s4778_s2 + $0x1f8] sm:$0xff]   ;;  %v87_v13 = vpack.c.bf16 %v68_v12, %v49_v11  ;;  %v48_v15 = vld [vmem:[%s4779_s0 + $0x20] sm:$0xff]  ;;  %v70_v20 = vld [vmem:[%s4779_s0 + $0xd0] sm:$0xff] }
  0x1a   :  { %3282 = vmatprep.subr.bf16.mxu1 %v3534_v26  ;;  %v3571_v14 = vld [vmem:[%s4778_s2 + $0x1b8] sm:$0xff]   ;;  %v3572_v18 = vld [vmem:[%s4778_s2 + $0x240] sm:$0xff]   ;;  %v50_v23 = vld [vmem:[%s4779_s0 + $0x30] sm:$0xff] }
  0x1b   :  { %3261 = vmatpush3.bf16.msra.mxu0 %v3533_v25  ;;  %v67_v16 = vld [vmem:[%s4779_s0 + $0xb8] sm:$0xff]  ;;  %v3573_v22 = vld [vmem:[%s4778_s2 + $0x200] sm:$0xff]   ;;  %v69_v24 = vld [vmem:[%s4779_s0 + $0xc8] sm:$0xff] }
  0x1c   :  { %3262 = vmatprep.subr.bf16.mxu0 %v3536_v28  ;;  %v86_v17 = vpack.c.bf16 %v67_v16, %v48_v15  ;;  %v51_v19 = vld [vmem:[%s4779_s0 + $0x38] sm:$0xff]  ;;  %v88_v25 = vpack.c.bf16 %v69_v24, %v50_v23  ;;  %v3574_v26 = vld [vmem:[%s4778_s2 + $0x2c0] sm:$0xff]   ;;  %v3576_v28 = vld [vmem:[%s4778_s2 + $0x248] sm:$0xff]  }
  0x1d   :  { %3283 = vmatpush3.bf16.msra.mxu1 %v3535_v27  ;;  %v89_v21 = vpack.c.bf16 %v70_v20, %v51_v19  ;;  %v3575_v27 = vld [vmem:[%s4778_s2 + $0x280] sm:$0xff]   ;;  %v3579_v31 = vld [vmem:[%s4778_s2 + $0x288] sm:$0xff]   ;;  %v3580_v32 = vld [vmem:[%s4778_s2 + $0x250] sm:$0xff]  }
  0x1e   :  { %3284 = vmatprep.subr.bf16.mxu1 %v3538_v30  ;;  %v3578_v30 = vld [vmem:[%s4778_s2 + $0x2c8] sm:$0xff]   ;;  %v3581_v33 = vld [vmem:[%s4778_s2 + $0x210] sm:$0xff]   ;;  %v3584_v36 = vld [vmem:[%s4778_s2 + $0x258] sm:$0xff]  }
  0x1f   :  { %3263 = vmatpush3.bf16.msra.mxu0 %v3537_v29  ;;  %v3577_v29 = vld [vmem:[%s4778_s2 + $0x208] sm:$0xff]   ;;  %v3583_v35 = vld [vmem:[%s4778_s2 + $0x290] sm:$0xff]   ;;  %v3587_v39 = vld [vmem:[%s4778_s2 + $0x298] sm:$0xff]  }
  0x20   :  { %3292 = vmatprep.subr.bf16.mxu0 %v3540_v38  ;;  %v3586_v38 = vld [vmem:[%s4778_s2 + $0x2d8] sm:$0xff]   ;;  %v3588_v40 = vld [vmem:[%s4778_s2 + $0x260] sm:$0xff]   ;;  %v3592_v44 = vld [vmem:[%s4778_s2 + $0x268] sm:$0xff]  }
  0x21   :  { %3285 = vmatpush3.bf16.msra.mxu1 %v3539_v34  ;;  %v3582_v34 = vld [vmem:[%s4778_s2 + $0x2d0] sm:$0xff]   ;;  %v3589_v41 = vld [vmem:[%s4778_s2 + $0x220] sm:$0xff]   ;;  %v3611_v11 = vld [vmem:[%s4778_s2 + $0x388] sm:$0xff]  }
  0x22   :  { %1321 = vmatmul.mubr.bf16.vlgmr.msra.gmra.mrb[0].mxu0 %v82_v37  ;;  %3314 = vmatprep.subr.bf16.mxu1 %v3542_v46  ;;  %v3585_v37 = vld [vmem:[%s4778_s2 + $0x218] sm:$0xff]   ;;  %v3591_v43 = vld [vmem:[%s4778_s2 + $0x2a0] sm:$0xff]   ;;  %v3594_v46 = vld [vmem:[%s4778_s2 + $0x2e8] sm:$0xff]  }
  0x23   :  { %3293 = vmatpush3.bf16.msra.mxu0 %v3541_v42  ;;  %1402 = vmatprep.mubr.bf16.mxu0 %v87_v13  ;;  %v3590_v42 = vld [vmem:[%s4778_s2 + $0x2e0] sm:$0xff]   ;;  %v3612_v12 = vld [vmem:[%s4778_s2 + $0x350] sm:$0xff]   ;;  %v3616_v16 = vld [vmem:[%s4778_s2 + $0x358] sm:$0xff]  }
  0x24   :  { %1362 = vmatmul.mubr.bf16.vlgmr.msra.gmra.mrb[0].mxu1 %v84_v45  ;;  %3294 = vmatprep.subr.bf16.mxu0 %v3544_v48  ;;  %v3593_v45 = vld [vmem:[%s4778_s2 + $0x228] sm:$0xff]   ;;  %v3596_v48 = vld [vmem:[%s4778_s2 + $0x270] sm:$0xff]   ;;  %v3619_v19 = vld [vmem:[%s4778_s2 + $0x398] sm:$0xff]  }
  0x25   :  { %3315 = vmatpush3.bf16.msra.mxu1 %v3543_v47  ;;  %1443 = vmatprep.mubr.bf16.mxu1 %v89_v21  ;;  %v3595_v47 = vld [vmem:[%s4778_s2 + $0x2a8] sm:$0xff]   ;;  %v3613_v13 = vld [vmem:[%s4778_s2 + $0x310] sm:$0xff]   ;;  %v3620_v20 = vld [vmem:[%s4778_s2 + $0x360] sm:$0xff]  }
  0x26   :  { %3316 = vmatprep.subr.bf16.mxu1 %v3546_v50  ;;  %v3598_v50 = vld [vmem:[%s4778_s2 + $0x2f0] sm:$0xff]   ;;  %v3621_v21 = vld [vmem:[%s4778_s2 + $0x320] sm:$0xff]   ;;  %v3624_v24 = vld [vmem:[%s4778_s2 + $0x368] sm:$0xff]  }
  0x27   :  { %3295 = vmatpush3.bf16.msra.mxu0 %v3545_v49  ;;  %v3597_v49 = vld [vmem:[%s4778_s2 + $0x230] sm:$0xff]   ;;  %v3623_v23 = vld [vmem:[%s4778_s2 + $0x3a0] sm:$0xff]  }
  0x28   :  { %3296 = vmatprep.subr.bf16.mxu0 %v3548_v52  ;;  %v3600_v52 = vld [vmem:[%s4778_s2 + $0x278] sm:$0xff]   ;;  %v3615_v15 = vld [vmem:[%s4778_s2 + $0x390] sm:$0xff]  }
  0x29   :  { %3317 = vmatpush3.bf16.msra.mxu1 %v3547_v51  ;;  %v3599_v51 = vld [vmem:[%s4778_s2 + $0x2b0] sm:$0xff]  }
  0x2a   :  { %3318 = vmatprep.subr.bf16.mxu1 %v3550_v54  ;;  %v3602_v54 = vld [vmem:[%s4778_s2 + $0x2f8] sm:$0xff]  }
  0x2b   :  { %3297 = vmatpush3.bf16.msra.mxu0 %v3549_v53  ;;  %v3601_v53 = vld [vmem:[%s4778_s2 + $0x238] sm:$0xff]  }
  0x2c   :  { %3298 = vmatprep.subr.bf16.mxu0 %v3552_v56  ;;  %v72_v56 = vld [vmem:[%s4779_s0 + $0xe0] sm:$0xff] }
  0x2d   :  { %3319 = vmatpush3.bf16.msra.mxu1 %v3551_v55  ;;  %v53_v55 = vld [vmem:[%s4779_s0 + $0x48] sm:$0xff] }
  0x2e   :  { %3320 = vmatprep.subr.bf16.mxu1 %v3554_v58  ;;  %v3603_v58 = vld [vmem:[%s4778_s2 + $0x2b8] sm:$0xff]  }
  0x2f   :  { %3299 = vmatpush3.bf16.msra.mxu0 %v3553_v57  ;;  %v91_v57 = vpack.c.bf16 %v72_v56, %v53_v55  ;;  %v3642_v55 = vld [vmem:[%s4778_s2 + $0x458] sm:$0xff]  }
  0x30   :  { %3300 = vmatprep.subr.bf16.mxu0 %v3556_v60  ;;  %v71_v60 = vld [vmem:[%s4779_s0 + $0xd8] sm:$0xff] }
  0x31   :  { %3321 = vmatpush3.bf16.msra.mxu1 %v3555_v59  ;;  %v52_v59 = vld [vmem:[%s4779_s0 + $0x40] sm:$0xff]  ;;  %v3643_v56 = vld [vmem:[%s4778_s2 + $0x418] sm:$0xff]  }
  0x32   :  { %3322 = vmatprep.subr.bf16.mxu1 %v3558_v62  ;;  %v3604_v62 = vld [vmem:[%s4778_s2 + $0x340] sm:$0xff]  }
  0x33   :  { %3301 = vmatpush3.bf16.msra.mxu0 %v3557_v61  ;;  %v90_v61 = vpack.c.bf16 %v71_v60, %v52_v59  ;;  %v3645_v59 = vld [vmem:[%s4778_s2 + $0x420] sm:$0xff]   ;;  %v3646_v60 = vld [vmem:[%s4778_s2 + $0x468] sm:$0xff]  }
  0x34   :  { %3302 = vmatprep.subr.bf16.mxu0 %v3560_v0  ;;  %v74_v0 = vld [vmem:[%s4779_s0 + $0xf0] sm:$0xff] }
  0x35   :  { %3323 = vmatpush3.bf16.msra.mxu1 %v3559_v63  ;;  %v55_v63 = vld [vmem:[%s4779_s0 + $0x58] sm:$0xff] }
  0x36   :  { %3324 = vmatprep.subr.bf16.mxu1 %v3562_v2  ;;  %v3605_v2 = vld [vmem:[%s4778_s2 + $0x300] sm:$0xff]  }
  0x37   :  { %3303 = vmatpush3.bf16.msra.mxu0 %v3561_v1  ;;  %v93_v1 = vpack.c.bf16 %v74_v0, %v55_v63  ;;  %v61_v63 = vld [vmem:[%s4779_s0 + $0x88] sm:$0xff]  ;;  %v80_v0 = vld [vmem:[%s4779_s0 + $0x120] sm:$0xff] }
  0x38   :  { %3304 = vmatprep.subr.bf16.mxu0 %v3564_v4  ;;  %v73_v4 = vld [vmem:[%s4779_s0 + $0xe8] sm:$0xff] }
  0x39   :  { %3325 = vmatpush3.bf16.msra.mxu1 %v3563_v3  ;;  %v54_v3 = vld [vmem:[%s4779_s0 + $0x50] sm:$0xff] }
  0x3a   :  { %3326 = vmatprep.subr.bf16.mxu1 %v3566_v6  ;;  %v3606_v6 = vld [vmem:[%s4778_s2 + $0x3c0] sm:$0xff]  }
  0x3b   :  { %3305 = vmatpush3.bf16.msra.mxu0 %v3565_v5  ;;  %v92_v5 = vpack.c.bf16 %v73_v4, %v54_v3  ;;  %v3654_v3 = vld [vmem:[%s4778_s2 + $0x490] sm:$0xff]  }
  0x3c   :  { %3306 = vmatprep.subr.bf16.mxu0 %v3568_v8  ;;  %v3608_v8 = vld [vmem:[%s4778_s2 + $0x348] sm:$0xff]   ;;  %v62_v4 = vld [vmem:[%s4779_s0 + $0x90] sm:$0xff] }
  0x3d   :  { %3327 = vmatpush3.bf16.msra.mxu1 %v3567_v7  ;;  %v3607_v7 = vld [vmem:[%s4778_s2 + $0x380] sm:$0xff]  }
  0x3e   :  { %3328 = vmatprep.subr.bf16.mxu1 %v3570_v10  ;;  %v3610_v10 = vld [vmem:[%s4778_s2 + $0x3c8] sm:$0xff]  }
  0x3f   :  { %3307 = vmatpush3.bf16.msra.mxu0 %v3569_v9  ;;  %v3609_v9 = vld [vmem:[%s4778_s2 + $0x308] sm:$0xff]  }
  0x40   :  { %3336 = vmatprep.subr.bf16.mxu0 %v3572_v18  ;;  %v3618_v18 = vld [vmem:[%s4778_s2 + $0x3d8] sm:$0xff]  }
  0x41   :  { %3329 = vmatpush3.bf16.msra.mxu1 %v3571_v14  ;;  %v3614_v14 = vld [vmem:[%s4778_s2 + $0x3d0] sm:$0xff]  }
  0x42   :  { %1403 = vmatmul.mubr.bf16.vlgmr.msra.gmra.mrb[4].mxu0 %v86_v17  ;;  %3358 = vmatprep.subr.bf16.mxu1 %v3574_v26  ;;  %v3617_v17 = vld [vmem:[%s4778_s2 + $0x318] sm:$0xff]   ;;  %v3626_v26 = vld [vmem:[%s4778_s2 + $0x3e8] sm:$0xff]  }
  0x43   :  { %3337 = vmatpush3.bf16.msra.mxu0 %v3573_v22  ;;  %1484 = vmatprep.mubr.bf16.mxu0 %v91_v57  ;;  %v3622_v22 = vld [vmem:[%s4778_s2 + $0x3e0] sm:$0xff]  }
  0x44   :  { %1444 = vmatmul.mubr.bf16.vlgmr.msra.gmra.mrb[4].mxu1 %v88_v25  ;;  %3338 = vmatprep.subr.bf16.mxu0 %v3576_v28  ;;  %v3625_v25 = vld [vmem:[%s4778_s2 + $0x328] sm:$0xff]   ;;  %v3628_v28 = vld [vmem:[%s4778_s2 + $0x370] sm:$0xff]   ;;  %v3644_v57 = vld [vmem:[%s4778_s2 + $0x460] sm:$0xff]  }
  0x45   :  { %3359 = vmatpush3.bf16.msra.mxu1 %v3575_v27  ;;  %1525 = vmatprep.mubr.bf16.mxu1 %v93_v1  ;;  %v3627_v27 = vld [vmem:[%s4778_s2 + $0x3a8] sm:$0xff]   ;;  %v3649_v1 = vld [vmem:[%s4778_s2 + $0x470] sm:$0xff]  }
  0x46   :  { %3360 = vmatprep.subr.bf16.mxu1 %v3578_v30  ;;  %v3630_v30 = vld [vmem:[%s4778_s2 + $0x3f0] sm:$0xff]  }
  0x47   :  { %3339 = vmatpush3.bf16.msra.mxu0 %v3577_v29  ;;  %v3629_v29 = vld [vmem:[%s4778_s2 + $0x330] sm:$0xff]  }
  0x48   :  { %3340 = vmatprep.subr.bf16.mxu0 %v3580_v32  ;;  %v3632_v32 = vld [vmem:[%s4778_s2 + $0x378] sm:$0xff]  }
  0x49   :  { %3361 = vmatpush3.bf16.msra.mxu1 %v3579_v31  ;;  %v3631_v31 = vld [vmem:[%s4778_s2 + $0x3b0] sm:$0xff]  }
  0x4a   :  { %3362 = vmatprep.subr.bf16.mxu1 %v3582_v34  ;;  %v3634_v34 = vld [vmem:[%s4778_s2 + $0x3f8] sm:$0xff]  }
  0x4b   :  { %3341 = vmatpush3.bf16.msra.mxu0 %v3581_v33  ;;  %v3633_v33 = vld [vmem:[%s4778_s2 + $0x338] sm:$0xff]  }
  0x4c   :  { %3342 = vmatprep.subr.bf16.mxu0 %v3584_v36  ;;  %v76_v36 = vld [vmem:[%s4779_s0 + $0x100] sm:$0xff] }
  0x4d   :  { %3363 = vmatpush3.bf16.msra.mxu1 %v3583_v35  ;;  %v57_v35 = vld [vmem:[%s4779_s0 + $0x68] sm:$0xff] }
  0x4e   :  { %3364 = vmatprep.subr.bf16.mxu1 %v3586_v38  ;;  %v3635_v38 = vld [vmem:[%s4778_s2 + $0x3b8] sm:$0xff]  }
  0x4f   :  { %3343 = vmatpush3.bf16.msra.mxu0 %v3585_v37  ;;  %v95_v37 = vpack.c.bf16 %v76_v36, %v57_v35 }
  0x50   :  { %3344 = vmatprep.subr.bf16.mxu0 %v3588_v40  ;;  %v75_v40 = vld [vmem:[%s4779_s0 + $0xf8] sm:$0xff] }
  0x51   :  { %3365 = vmatpush3.bf16.msra.mxu1 %v3587_v39  ;;  %v56_v39 = vld [vmem:[%s4779_s0 + $0x60] sm:$0xff] }
  0x52   :  { %3366 = vmatprep.subr.bf16.mxu1 %v3590_v42  ;;  %v3636_v42 = vld [vmem:[%s4778_s2 + $0x440] sm:$0xff]  }
  0x53   :  { %3345 = vmatpush3.bf16.msra.mxu0 %v3589_v41  ;;  %v94_v41 = vpack.c.bf16 %v75_v40, %v56_v39 }
  0x54   :  { %3346 = vmatprep.subr.bf16.mxu0 %v3592_v44  ;;  %v78_v44 = vld [vmem:[%s4779_s0 + $0x110] sm:$0xff] }
  0x55   :  { %3367 = vmatpush3.bf16.msra.mxu1 %v3591_v43  ;;  %v59_v43 = vld [vmem:[%s4779_s0 + $0x78] sm:$0xff] }
  0x56   :  { %3368 = vmatprep.subr.bf16.mxu1 %v3594_v46  ;;  %v3637_v46 = vld [vmem:[%s4778_s2 + $0x400] sm:$0xff]  }
  0x57   :  { %3347 = vmatpush3.bf16.msra.mxu0 %v3593_v45  ;;  %v97_v45 = vpack.c.bf16 %v78_v44, %v59_v43 }
  0x58   :  { %3348 = vmatprep.subr.bf16.mxu0 %v3596_v48  ;;  %v58_v48 = vld [vmem:[%s4779_s0 + $0x70] sm:$0xff] }
  0x59   :  { %3369 = vmatpush3.bf16.msra.mxu1 %v3595_v47  ;;  %v3788_v47 = vmov 0.0  }
  0x5a   :  { %3370 = vmatprep.subr.bf16.mxu1 %v3598_v50 }
  0x5b   :  { %3349 = vmatpush3.bf16.msra.mxu0 %v3597_v49  ;;  %v77_v49 = vld [vmem:[%s4779_s0 + $0x108] sm:$0xff] }
  0x5c   :  { %3350 = vmatprep.subr.bf16.mxu0 %v3600_v52  ;;  %v96_v50 = vpack.c.bf16 %v77_v49, %v58_v48  ;;  %v3639_v52 = vld [vmem:[%s4778_s2 + $0x408] sm:$0xff]  }
  0x5d   :  { %3371 = vmatpush3.bf16.msra.mxu1 %v3599_v51  ;;  %v3638_v51 = vld [vmem:[%s4778_s2 + $0x448] sm:$0xff]  }
  0x5e   :  { %3372 = vmatprep.subr.bf16.mxu1 %v3602_v54  ;;  %v3641_v54 = vld [vmem:[%s4778_s2 + $0x410] sm:$0xff]  }
  0x5f   :  { %3351 = vmatpush3.bf16.msra.mxu0 %v3601_v53  ;;  %v3640_v53 = vld [vmem:[%s4778_s2 + $0x450] sm:$0xff]  }
  0x60   :  { %3380 = vmatprep.subr.bf16.mxu0 %v3604_v62  ;;  %v3647_v62 = vld [vmem:[%s4778_s2 + $0x428] sm:$0xff]  }
  0x61   :  { %3373 = vmatpush3.bf16.msra.mxu1 %v3603_v58  ;;  %v3648_v58 = vld [vmem:[%s4778_s2 + $0x480] sm:$0xff]  }
  0x62   :  { %1485 = vmatmul.mubr.bf16.vlgmr.msra.gmra.mrb[8].mxu0 %v90_v61  ;;  %3402 = vmatprep.subr.bf16.mxu1 %v3606_v6  ;;  %v3651_v61 = vld [vmem:[%s4778_s2 + $0x488] sm:$0xff]  }
  0x63   :  { %3381 = vmatpush3.bf16.msra.mxu0 %v3605_v2  ;;  %1566 = vmatprep.mubr.bf16.mxu0 %v95_v37  ;;  %v99_v2 = vpack.c.bf16 %v80_v0, %v61_v63 }
  0x64   :  { %1526 = vmatmul.mubr.bf16.vlgmr.msra.gmra.mrb[8].mxu1 %v92_v5  ;;  %3382 = vmatprep.subr.bf16.mxu0 %v3608_v8  ;;  %v81_v5 = vld [vmem:[%s4779_s0 + $0x128] sm:$0xff]  ;;  %v3652_v8 = vld [vmem:[%s4778_s2 + $0x478] sm:$0xff]  }
  0x65   :  { %3403 = vmatpush3.bf16.msra.mxu1 %v3607_v7  ;;  %1607 = vmatprep.mubr.bf16.mxu1 %v97_v45  ;;  %v100_v6 = vpack.c.bf16 %v81_v5, %v62_v4  ;;  %v3650_v7 = vld [vmem:[%s4778_s2 + $0x430] sm:$0xff]  }
  0x66   :  { %3404 = vmatprep.subr.bf16.mxu1 %v3610_v10  ;;  %v60_v10 = vld [vmem:[%s4779_s0 + $0x80] sm:$0xff] }
  0x67   :  { %3383 = vmatpush3.bf16.msra.mxu0 %v3609_v9  ;;  %v3653_v9 = vld [vmem:[%s4778_s2 + $0x438] sm:$0xff]  }
  0x68   :  { %3384 = vmatprep.subr.bf16.mxu0 %v3612_v12 }
  0x69   :  { %3405 = vmatpush3.bf16.msra.mxu1 %v3611_v11  ;;  %v79_v11 = vld [vmem:[%s4779_s0 + $0x118] sm:$0xff] }
  0x6a   :  { %3406 = vmatprep.subr.bf16.mxu1 %v3614_v14  ;;  %v98_v12 = vpack.c.bf16 %v79_v11, %v60_v10  ;;  %v2990_v14 = vld [vmem:[%s4780_s3] ss:$0 sm:$0xff] }
  0x6b   :  { %3385 = vmatpush3.bf16.msra.mxu0 %v3613_v13 }
  0x6c   :  { %3386 = vmatprep.subr.bf16.mxu0 %v3616_v16 }
  0x6d   :  { %3407 = vmatpush3.bf16.msra.mxu1 %v3615_v15 }
  0x6e   :  { %3408 = vmatprep.subr.bf16.mxu1 %v3618_v18 }
  0x6f   :  { %3387 = vmatpush3.bf16.msra.mxu0 %v3617_v17 }
  0x70   :  { %3388 = vmatprep.subr.bf16.mxu0 %v3620_v20 }
  0x71   :  { %3409 = vmatpush3.bf16.msra.mxu1 %v3619_v19 }
  0x72   :  { %3410 = vmatprep.subr.bf16.mxu1 %v3622_v22 }
  0x73   :  { %3389 = vmatpush3.bf16.msra.mxu0 %v3621_v21 }
  0x74   :  { %3390 = vmatprep.subr.bf16.mxu0 %v3624_v24 }
  0x75   :  { %3411 = vmatpush3.bf16.msra.mxu1 %v3623_v23 }
  0x76   :  { %3412 = vmatprep.subr.bf16.mxu1 %v3626_v26 }
  0x77   :  { %3391 = vmatpush3.bf16.msra.mxu0 %v3625_v25 }
  0x78   :  { %3392 = vmatprep.subr.bf16.mxu0 %v3628_v28 }
  0x79   :  { %3413 = vmatpush3.bf16.msra.mxu1 %v3627_v27 }
  0x7a   :  { %3414 = vmatprep.subr.bf16.mxu1 %v3630_v30  ;;  %v3655_v30 = vld [vmem:[%s4781_s4] sm:$0xff]  }
  0x7b   :  { %3393 = vmatpush3.bf16.msra.mxu0 %v3629_v29 }
  0x7c   :  { %3394 = vmatprep.subr.bf16.mxu0 %v3632_v32 }
  0x7d   :  { %3415 = vmatpush3.bf16.msra.mxu1 %v3631_v31  ;;  %v3656_v31 = vld [vmem:[%s4781_s4 + $0x8] ss:$0 sps:$4 sm:$0x33]  }
  0x7e   :  { %3416 = vmatprep.subr.bf16.mxu1 %v3634_v34  ;;  %v1726_v32 = vsel %vm1724_vm2, %v3656_v31, 0 }
  0x7f   :  { %3395 = vmatpush3.bf16.msra.mxu0 %v3633_v33 }
  0x80   :  { %3424 = vmatprep.subr.bf16.mxu0 %v3636_v42 }
  0x81   :  { %3417 = vmatpush3.bf16.msra.mxu1 %v3635_v38 }
  0x82   :  { %3462 = vmatprep.subr.bf16.mxu1 %v3788_v47  ;;  %1567 = vmatmul.mubr.bf16.vlgmr.msra.gmra.mrb[12].mxu0 %v94_v41 }
  0x83   :  { %3425 = vmatpush3.bf16.msra.mxu0 %v3637_v46  ;;  %1648 = vmatprep.mubr.bf16.mxu0 %v99_v2 }
  0x84   :  { %1608 = vmatmul.mubr.bf16.vlgmr.msra.gmra.mrb[12].mxu1 %v96_v50  ;;  %3426 = vmatprep.subr.bf16.mxu0 %v3638_v51 }
  0x85   :  { %3468 = vmatprep.mubr.msk.bf16.mxu1 %vm3789_vm0, %v3788_v47  ;;  %3463 = vmatpush3.bf16.msra.mxu1 %v3648_v58 }
  0x86   :  { %3464 = vmatprep.subr.bf16.mxu1 %v3788_v47 }
  0x87   :  { %3427 = vmatpush3.bf16.msra.mxu0 %v3639_v52 }
  0x88   :  { %3428 = vmatprep.subr.bf16.mxu0 %v3640_v53 }
  0x89   :  { %3465 = vmatpush3.bf16.msra.mxu1 %v3651_v61 }
  0x8a   :  { %3466 = vmatprep.subr.bf16.mxu1 %v3788_v47 }
  0x8b   :  { %3429 = vmatpush3.bf16.msra.mxu0 %v3641_v54 }
  0x8c   :  { %3430 = vmatprep.subr.bf16.mxu0 %v3642_v55 }
  0x8d   :  { %3467 = vmatpush3.bf16.msra.mxu1 %v3654_v3 }
  0x8e   :  { %3472 = vmatprep.subr.bf16.mxu1 %v3788_v47 }
  0x8f   :  { %3431 = vmatpush3.bf16.msra.mxu0 %v3643_v56 }
  0x90   :  { %3432 = vmatprep.subr.bf16.mxu0 %v3644_v57  ;;  %3469 = vmatmul.mubr.msk.bf16.vlgmr.msra.gmra.mrb[16].mxu1 %vm1284_vm1, %v100_v6 }
  0x91   :  { %3476 = vmatprep.mubr.msk.bf16.mxu1 %vm3789_vm0, %v3788_v47  ;;  %3473 = vmatpush3.bf16.msra.mxu1 %v3655_v30 }
  0x92   :  { %3474 = vmatprep.subr.bf16.mxu1 %v3788_v47 }
  0x93   :  { %3433 = vmatpush3.bf16.msra.mxu0 %v3645_v59 }
  0x94   :  { %3434 = vmatprep.subr.bf16.mxu0 %v3646_v60 }
  0x95   :  { %3475 = vmatpush3.bf16.msra.mxu1 %v1726_v32 }
  0x96   :  { %3480 = vmatprep.subr.bf16.mxu1 %v3788_v47 }
  0x97   :  { %3435 = vmatpush3.bf16.msra.mxu0 %v3647_v62 }
  0x98   :  { %3436 = vmatprep.subr.bf16.mxu0 %v3649_v1 }
  0x9b   :  { %3437 = vmatpush3.bf16.msra.mxu0 %v3650_v7 }
  0x9c   :  { %3438 = vmatprep.subr.bf16.mxu0 %v3652_v8 }
  0x9f   :  { %3439 = vmatpush3.bf16.msra.mxu0 %v3653_v9 }
  0xa2   :  { %1649 = vmatmul.mubr.bf16.vlgmr.msra.gmra.mrb[16].mxu0 %v98_v12 }
  0xf5   :  { %v3264_v13 = vpop.f32.mrb[0].mxu0 }
  0xf6   :  { %v3265_v15 = vpop.f32.mrb[1].mxu0 }
  0xf7   :  { %v3266_v16 = vadd.f32 %v3265_v15, %v3264_v13  ;;  %v3267_v17 = vpop.f32.mrb[2].mxu0  ;;  %v3286_v18 = vpop.f32.mrb[0].mxu1 }
  0xf8   :  { %v3268_v19 = vpop.f32.mrb[3].mxu0  ;;  %v3287_v22 = vpop.f32.mrb[1].mxu1 }
  0xf9   :  { %v1323_v20 = vadd.f32 %v3266_v16, %v2990_v14  ;;  %v3269_v21 = vadd.f32 %v3268_v19, %v3267_v17  ;;  %v3288_v23 = vadd.f32 %v3287_v22, %v3286_v18  ;;  %v3289_v24 = vpop.f32.mrb[2].mxu1 }
  0xfa   :  { %v3290_v26 = vpop.f32.mrb[3].mxu1 }
  0xfb   :  { %v1326_v25 = vadd.f32 %v3269_v21, %v2990_v14  ;;  %v1364_v27 = vadd.f32 %v3288_v23, %v1323_v20  ;;  %v3291_v28 = vadd.f32 %v3290_v26, %v3289_v24 }
  0xfd   :  { %v1367_v29 = vadd.f32 %v3291_v28, %v1326_v25 }
 0x115   :  { %v3308_v33 = vpop.f32.mrb[4].mxu0 }
 0x116   :  { %v3309_v34 = vpop.f32.mrb[5].mxu0 }
 0x117   :  { %v3310_v35 = vadd.f32 %v3309_v34, %v3308_v33  ;;  %v3311_v36 = vpop.f32.mrb[6].mxu0  ;;  %v3330_v39 = vpop.f32.mrb[4].mxu1 }
 0x118   :  { %v3312_v37 = vpop.f32.mrb[7].mxu0  ;;  %v3331_v41 = vpop.f32.mrb[5].mxu1 }
 0x119   :  { %v1405_v38 = vadd.f32 %v3310_v35, %v1364_v27  ;;  %v3313_v40 = vadd.f32 %v3312_v37, %v3311_v36  ;;  %v3332_v43 = vadd.f32 %v3331_v41, %v3330_v39  ;;  %v3333_v44 = vpop.f32.mrb[6].mxu1  ;;  %v3657_v35 = vld [vmem:[%s4782_s6] sm:$0xff]   ;;  %v3658_v36 = vld [vmem:[%s4782_s6 + $0x8] ss:$0 sps:$4 sm:$0x33]  }
 0x11a   :  { %v3334_v45 = vpop.f32.mrb[7].mxu1  ;;  %v1795_v37 = vsel %vm1724_vm2, %v3658_v36, 0  ;;  %v3671_v36 = vld [vmem:[%s4788_s10 + $0x10] ss:$76 sps:$4 sm:$0xff]  }
 0x11b   :  { %v1408_v42 = vadd.f32 %v3313_v40, %v1367_v29  ;;  %v1446_v46 = vadd.f32 %v3332_v43, %v1405_v38  ;;  %v3335_v48 = vadd.f32 %v3334_v45, %v3333_v44  ;;  %v3139_v38 = vld [vmem:[%s4783_s5] ss:$0 sm:$0xff] }
 0x11d   :  { %v1449_v49 = vadd.f32 %v3335_v48, %v1408_v42 }
 0x135   :  { %v3352_v50 = vpop.f32.mrb[8].mxu0 }
 0x136   :  { %v3353_v51 = vpop.f32.mrb[9].mxu0 }
 0x137   :  { %v3354_v52 = vadd.f32 %v3353_v51, %v3352_v50  ;;  %v3355_v53 = vpop.f32.mrb[10].mxu0  ;;  %v3374_v54 = vpop.f32.mrb[8].mxu1 }
 0x138   :  { %v3356_v55 = vpop.f32.mrb[11].mxu0  ;;  %v3375_v58 = vpop.f32.mrb[9].mxu1 }
 0x139   :  { %v1487_v56 = vadd.f32 %v3354_v52, %v1446_v46  ;;  %v3357_v57 = vadd.f32 %v3356_v55, %v3355_v53  ;;  %v3376_v59 = vadd.f32 %v3375_v58, %v3374_v54  ;;  %v3377_v60 = vpop.f32.mrb[10].mxu1 }
 0x13a   :  { %v3378_v62 = vpop.f32.mrb[11].mxu1 }
 0x13b   :  { %v1490_v61 = vadd.f32 %v3357_v57, %v1449_v49  ;;  %v1528_v63 = vadd.f32 %v3376_v59, %v1487_v56  ;;  %v3379_v0 = vadd.f32 %v3378_v62, %v3377_v60  ;;  %v3143_v49 = vld [vmem:[%s4784_s7] ss:$0 sm:$0xff] }
 0x13c   :  { %v3659_v60 = vld [vmem:[%s4786_s8] sm:$0xff]  }
 0x13d   :  { %v1531_v1 = vadd.f32 %v3379_v0, %v1490_v61  ;;  %v3660_v61 = vld [vmem:[%s4786_s8 + $0x8] ss:$0 sps:$4 sm:$0x33]  }
 0x13e   :  { %v1882_v62 = vsel %vm1724_vm2, %v3660_v61, 0  ;;  %v1955_v61 = vld [vmem:[%s4788_s10 + $0xd0] sm:$0x33] }
 0x155   :  { %v3396_v2 = vpop.f32.mrb[12].mxu0 }
 0x156   :  { %v3397_v3 = vpop.f32.mrb[13].mxu0 }
 0x157   :  { %v3398_v4 = vadd.f32 %v3397_v3, %v3396_v2  ;;  %v3399_v5 = vpop.f32.mrb[14].mxu0  ;;  %v3418_v6 = vpop.f32.mrb[12].mxu1  ;;  %v1839_v3 = vld [vmem:[%s4787_s1 + $0x8] sm:$0xff] }
 0x158   :  { %v3400_v7 = vpop.f32.mrb[15].mxu0  ;;  %v3419_v10 = vpop.f32.mrb[13].mxu1 }
 0x159   :  { %v1569_v8 = vadd.f32 %v3398_v4, %v1528_v63  ;;  %v3401_v9 = vadd.f32 %v3400_v7, %v3399_v5  ;;  %v3420_v11 = vadd.f32 %v3419_v10, %v3418_v6  ;;  %v3421_v12 = vpop.f32.mrb[14].mxu1  ;;  %v3663_v10 = vld [vmem:[%s4788_s10 + $0x4] ss:$76 sps:$4 sm:$0xff]  }
 0x15a   :  { %v3422_v14 = vpop.f32.mrb[15].mxu1  ;;  %2263 = vmatprep.subr.bf16.mxu0 %v3663_v10 }
 0x15b   :  { %v1572_v13 = vadd.f32 %v3401_v9, %v1531_v1  ;;  %v1610_v15 = vadd.f32 %v3420_v11, %v1569_v8  ;;  %v3423_v16 = vadd.f32 %v3422_v14, %v3421_v12  ;;  %v1838_v1 = vld [vmem:[%s4787_s1] sm:$0xff]  ;;  %v3664_v12 = vld [vmem:[%s4788_s10 + $0x8] ss:$76 sps:$4 sm:$0xff]   ;;  %v1948_v14 = vld [vmem:[%s4788_s10 + $0x98] sm:$0x33] }
 0x15c   :  { %v3661_v11 = vld [vmem:[%s4788_s10] ss:$76 sps:$4 sm:$0xff]  }
 0x15d   :  { %v1613_v17 = vadd.f32 %v3423_v16, %v1572_v13  ;;  %v3666_v13 = vld [vmem:[%s4788_s10 + $0xc] ss:$76 sps:$4 sm:$0xff]   ;;  %2264 = vmatpush1.bf16.msra.mxu0 %v3661_v11  ;;  %v3171_v16 = vcombine.high %v1948_v14, %v1948_v14 }
 0x15f   :  { %3189 = vmatprep.subr.msk.bf16.mxu0 %vm1724_vm2, %v3171_v16 }
 0x163   :  { %v1691_v18 = vpop.f32.mrb[16].mxu1 }
 0x164   :  { %v3470_v19 = vpop.f32.mrb[17].mxu1 }
 0x165   :  { %v1694_v20 = vpop.f32.mrb[18].mxu1 }
 0x166   :  { %v3471_v21 = vpop.f32.mrb[19].mxu1 }
 0x175   :  { %v3440_v22 = vpop.f32.mrb[16].mxu0 }
 0x176   :  { %v3441_v23 = vpop.f32.mrb[17].mxu0 }
 0x177   :  { %v3442_v24 = vadd.f32 %v3441_v23, %v3440_v22  ;;  %v3443_v25 = vpop.f32.mrb[18].mxu0  ;;  %v3673_v22 = vld [vmem:[%s4788_s10 + $0x14] ss:$76 sps:$4 sm:$0xff]   ;;  %v3791_v23 = vmov 0  }
 0x178   :  { %v3444_v26 = vpop.f32.mrb[19].mxu0  ;;  %2295 = vmatprep.mubr.bf16.mxu0 %v3791_v23 }
 0x179   :  { %v1651_v27 = vadd.f32 %v3442_v24, %v1610_v15  ;;  %v3445_v28 = vadd.f32 %v3444_v26, %v3443_v25  ;;  %v1949_v15 = vld [vmem:[%s4788_s10 + $0xa0] sm:$0x33]  ;;  %v3676_v24 = vld [vmem:[%s4788_s10 + $0x1c] ss:$76 sps:$4 sm:$0xff]  }
 0x17a   :  { %v3172_v19 = vcombine.low %v1949_v15, %v1949_v15  ;;  %v3147_v25 = vld [vmem:[%s4789_s9] ss:$0 sm:$0xff] }
 0x17b   :  { %v1692_v29 = vadd.f32 %v1691_v18, %v1651_v27  ;;  %v1654_v30 = vadd.f32 %v3445_v28, %v1613_v17  ;;  %v3170_v17 = vcombine.low %v1948_v14, %v1948_v14  ;;  %v3173_v18 = vcombine.high %v1949_v15, %v1949_v15 }
 0x17c   :  { %v2213_v21 = vsel %vm1724_vm2, %v3172_v19, 0  ;;  %v1964_v15 = vlaneseq }
 0x17d   :  { %v1695_v31 = vadd.f32 %v1694_v20, %v1654_v30  ;;  %v1698_v32 = vmax.f32 %v1692_v29, 0.0  ;;  %v2207_v20 = vsel %vm1724_vm2, %v3170_v17, 0 }
 0x17e   :  { %2266 = vmatpush1.bf16.msra.mxu0 %v2207_v20  ;;  %v4623_v16 = vshrl.u32 %v1964_v15, 7 }
 0x17f   :  { %v1699_v33 = vmax.f32 %v1695_v31, 0.0  ;;  %2349 = vmatprep.subr.bf16.mxu0 %v3673_v22 }
 0x180   :  { %v4626_v17 = vsub.s32 0, %v4623_v16  ;;  %v4635_v19 = vsub.s32 1, %v4623_v16  ;;  %v1978_v20 = vsub.s32 3, %v4623_v16 }
 0x181   :  { %v1700_v34 = vpack.c.bf16 %v1699_v33, %v1698_v32  ;;  %v1950_v32 = vld [vmem:[%s4788_s10 + $0xa8] sm:$0x33]  ;;  %v1951_v33 = vld [vmem:[%s4788_s10 + $0xb0] sm:$0x33] }
 0x183   :  { %3477 = vmatmul.mubr.msk.bf16.vlgmr.msra.gmra.mrb[20].mxu1 %vm1720_vm3, %v1700_v34 }
 0x184   :  { %3484 = vmatprep.mubr.msk.bf16.mxu1 %vm3789_vm0, %v3788_v47  ;;  %3481 = vmatpush3.bf16.msra.mxu1 %v3657_v35 }
 0x185   :  { %3482 = vmatprep.subr.bf16.mxu1 %v3788_v47 }
 0x188   :  { %3483 = vmatpush3.bf16.msra.mxu1 %v1795_v37  ;;  %v3674_v37 = vld [vmem:[%s4788_s10 + $0x18] ss:$76 sps:$4 sm:$0xff]  }
 0x189   :  { %3488 = vmatprep.subr.bf16.mxu1 %v3788_v47 }
 0x256   :  { %v1762_v39 = vpop.f32.mrb[20].mxu1 }
 0x257   :  { %v1763_v40 = vadd.f32 %v3139_v38, %v1762_v39  ;;  %v3478_v41 = vpop.f32.mrb[21].mxu1  ;;  %v3176_v39 = vcombine.low %v1951_v33, %v1951_v33 }
 0x258   :  { %v1765_v42 = vpop.f32.mrb[22].mxu1  ;;  %v3175_v41 = vcombine.high %v1950_v32, %v1950_v32 }
 0x259   :  { %v1766_v43 = vadd.f32 %v3139_v38, %v1765_v42  ;;  %v3479_v44 = vpop.f32.mrb[23].mxu1  ;;  %v1769_v45 = vmax.f32 %v1763_v40, 0.0  ;;  %v3174_v38 = vcombine.low %v1950_v32, %v1950_v32  ;;  %v3177_v42 = vcombine.high %v1951_v33, %v1951_v33 }
 0x25a   :  { %v2225_v44 = vsel %vm1724_vm2, %v3176_v39, 0  ;;  %v1990_v32 = vsub.s32 6, %v4623_v16 }
 0x25b   :  { %v1770_v46 = vmax.f32 %v1766_v43, 0.0  ;;  %v2219_v43 = vsel %vm1724_vm2, %v3174_v38, 0  ;;  %v1994_v38 = vsub.s32 7, %v4623_v16 }
 0x25d   :  { %v1771_v48 = vpack.c.bf16 %v1770_v46, %v1769_v45  ;;  %v3683_v45 = vld [vmem:[%s4788_s10 + $0x24] ss:$76 sps:$4 sm:$0xff]   ;;  %v3686_v46 = vld [vmem:[%s4788_s10 + $0x2c] ss:$76 sps:$4 sm:$0xff]  }
 0x25f   :  { %3485 = vmatmul.mubr.msk.bf16.vlgmr.msra.gmra.mrb[24].mxu1 %vm1720_vm3, %v1771_v48  ;;  %v1952_v48 = vld [vmem:[%s4788_s10 + $0xb8] sm:$0x33] }
 0x260   :  { %3492 = vmatprep.mubr.msk.bf16.mxu1 %vm3789_vm0, %v3788_v47  ;;  %3489 = vmatpush3.bf16.msra.mxu1 %v3659_v60  ;;  %v1954_v60 = vld [vmem:[%s4788_s10 + $0xc8] sm:$0x33] }
 0x261   :  { %3490 = vmatprep.subr.bf16.mxu1 %v3788_v47 }
 0x264   :  { %3491 = vmatpush3.bf16.msra.mxu1 %v1882_v62  ;;  %v3691_v62 = vld [vmem:[%s4788_s10 + $0x30] ss:$76 sps:$4 sm:$0xff]  }
 0x265   :  { %2306 = vmatprep.subr.bf16.mxu1 %v3666_v13 }
 0x332   :  { %v1831_v50 = vpop.f32.mrb[24].mxu1 }
 0x333   :  { %v1832_v51 = vadd.f32 %v3143_v49, %v1831_v50  ;;  %v3486_v52 = vpop.f32.mrb[25].mxu1  ;;  %v3681_v50 = vld [vmem:[%s4788_s10 + $0x20] ss:$76 sps:$4 sm:$0xff]  }
 0x334   :  { %v1834_v53 = vpop.f32.mrb[26].mxu1  ;;  %v3178_v52 = vcombine.low %v1952_v48, %v1952_v48 }
 0x335   :  { %v1840_v54 = vmul.f32 0.5, %v1832_v51  ;;  %2980 = vst [vmem:[%s4785_s13] sm:$0xff] %v1832_v51  ;;  %v1835_v55 = vadd.f32 %v3143_v49, %v1834_v53  ;;  %v3487_v56 = vpop.f32.mrb[27].mxu1  ;;  %v1953_v49 = vld [vmem:[%s4788_s10 + $0xc0] sm:$0x33] }
 0x336   :  { %v3180_v53 = vcombine.low %v1953_v49, %v1953_v49  ;;  %v2231_v56 = vsel %vm1724_vm2, %v3178_v52, 0 }
 0x337   :  { %v1842_v57 = vmul.f32 1.442695, %v1840_v54  ;;  %v1841_v58 = vmul.f32 0.5, %v1835_v55  ;;  %2981 = vst [vmem:[%s4785_s13 + $0x8] sm:$0xff] %v1835_v55  ;;  %v3179_v54 = vcombine.high %v1952_v48, %v1952_v48 }
 0x339   :  { %3708 = vpow2.f32 %v1842_v57  ;;  %v1844_v59 = vmul.f32 1.442695, %v1841_v58  ;;  %v2237_v57 = vsel %vm1724_vm2, %v3180_v53, 0  ;;  %v3693_v58 = vld [vmem:[%s4788_s10 + $0x34] ss:$76 sps:$4 sm:$0xff]  }
 0x33b   :  { %3710 = vpow2.f32 %v1844_v59  ;;  %v3696_v59 = vld [vmem:[%s4788_s10 + $0x3c] ss:$76 sps:$4 sm:$0xff]  }
 0x343   :  { %v3709_v63 = vpop.eup %3708 }
 0x344   :  { %1848 = vrot.lane.b32.xlu0 %v3709_v63, %s3790_s19  ;;  %v3694_v63 = vld [vmem:[%s4788_s10 + $0x38] ss:$76 sps:$4 sm:$0xff]  }
 0x345   :  { %v3711_v0 = vpop.eup %3710 }
 0x348   :  { %1850 = vrot.lane.b32.xlu0 %v3711_v0, %s3790_s19  ;;  %v3183_v0 = vcombine.high %v1954_v60, %v1954_v60 }
 0x3b6   :  { %v1849_v2 = vpop.permute.xlu0 %1848 }
 0x3b7   :  { %v1854_v4 = vmul.f32 %v1849_v2, %v1838_v1  ;;  %v3182_v1 = vcombine.low %v1954_v60, %v1954_v60  ;;  %v3185_v2 = vcombine.high %v1955_v61, %v1955_v61 }
 0x3b9   :  { %v1856_v7 = vadd.f32 %v1854_v4, %v1832_v51  ;;  %v3684_v51 = vld [vmem:[%s4788_s10 + $0x28] ss:$76 sps:$4 sm:$0xff]   ;;  %v2243_v4 = vsel %vm1724_vm2, %v3182_v1, 0 }
 0x3ba   :  { %v1851_v5 = vpop.permute.xlu0 %1850 }
 0x3bb   :  { %v1855_v6 = vmul.f32 %v1851_v5, %v1839_v3  ;;  %v3184_v3 = vcombine.low %v1955_v61, %v1955_v61 }
 0x3bd   :  { %v1857_v8 = vadd.f32 %v1855_v6, %v1835_v55  ;;  %v3181_v55 = vcombine.high %v1953_v49, %v1953_v49  ;;  %v2249_v5 = vsel %vm1724_vm2, %v3184_v3, 0  ;;  %v3703_v6 = vld [vmem:[%s4788_s10 + $0x44] ss:$76 sps:$4 sm:$0xff]  }
 0x3bf   :  { %v1858_v9 = vpack.c.bf16 %v1857_v8, %v1856_v7  ;;  %v1956_v7 = vld [vmem:[%s4788_s10 + $0xd8] sm:$0x33]  ;;  %v3701_v8 = vld [vmem:[%s4788_s10 + $0x40] ss:$76 sps:$4 sm:$0xff]  }
 0x3c0   :  { %v3187_v10 = vcombine.high %v1956_v7, %v1956_v7  ;;  %v3186_v11 = vcombine.low %v1956_v7, %v1956_v7 }
 0x3c1   :  { %3493 = vmatmul.mubr.msk.bf16.vlgmr.msra.gmra.mrb[28].mxu1 %vm1720_vm3, %v1858_v9  ;;  %v3704_v9 = vld [vmem:[%s4788_s10 + $0x48] ss:$76 sps:$4 sm:$0xff]  }
 0x3c2   :  { %2307 = vmatpush1.bf16.msra.mxu1 %v3664_v12  ;;  %2338 = vmatprep.mubr.bf16.mxu1 %v3791_v23  ;;  %v3707_v12 = vld [vmem:[%s4788_s10 + $0xe0] ss:$0 sps:$4 sm:$0x33]   ;;  %v2255_v13 = vsel %vm1724_vm2, %v3186_v11, 0 }
 0x3c3   :  { %3191 = vmatprep.subr.msk.bf16.mxu1 %vm1724_vm2, %v3173_v18  ;;  %v2261_v14 = vsel %vm1724_vm2, %v3707_v12, 0  ;;  %v4629_v18 = vsub.s32 2, %v4623_v16 }
 0x3c6   :  { %2309 = vmatpush1.bf16.msra.mxu1 %v2213_v21 }
 0x3c7   :  { %2392 = vmatprep.subr.bf16.mxu1 %v3676_v24 }
 0x494   :  { %v1918_v26 = vpop.f32.mrb[28].mxu1 }
 0x495   :  { %v1919_v27 = vadd.f32 %v3147_v25, %v1918_v26  ;;  %v3494_v28 = vpop.f32.mrb[29].mxu1 }
 0x496   :  { %v1921_v29 = vpop.f32.mrb[30].mxu1 }
 0x497   :  { %v1922_v30 = vadd.f32 %v3147_v25, %v1921_v29  ;;  %v3495_v31 = vpop.f32.mrb[31].mxu1  ;;  %v1925_v34 = vmax.f32 %v1919_v27, 0.0 }
 0x498   :  { %v1982_v31 = vsub.s32 4, %v4623_v16 }
 0x499   :  { %v1926_v35 = vmax.f32 %v1922_v30, 0.0 }
 0x49b   :  { %v4524_v40 = vpack.c.bf16 %v1926_v35, %v1925_v34 }
 0x49d   :  { %3190 = vmatmul.mubr.msk.bf16.vlgmr.msra.gmra.mrb[20].mxu0 %vm1720_vm3, %v4524_v40  ;;  %3192 = vmatmul.mubr.msk.bf16.vlgmr.msra.gmra.mrb[32].mxu1 %vm1720_vm3, %v4524_v40 }
 0x49e   :  { %2350 = vmatpush1.bf16.msra.mxu0 %v3671_v36  ;;  %2393 = vmatpush1.bf16.msra.mxu1 %v3674_v37  ;;  %v1986_v37 = vsub.s32 5, %v4623_v16 }
 0x49f   :  { %3193 = vmatprep.subr.msk.bf16.mxu0 %vm1724_vm2, %v3175_v41  ;;  %3195 = vmatprep.subr.msk.bf16.mxu1 %vm1724_vm2, %v3177_v42 }
 0x4a0   :  { %2381 = vmatprep.mubr.bf16.mxu0 %v3791_v23  ;;  %2424 = vmatprep.mubr.bf16.mxu1 %v3791_v23 }
 0x4a2   :  { %2352 = vmatpush1.bf16.msra.mxu0 %v2219_v43  ;;  %2395 = vmatpush1.bf16.msra.mxu1 %v2225_v44 }
 0x4a3   :  { %2435 = vmatprep.subr.bf16.mxu0 %v3683_v45  ;;  %2478 = vmatprep.subr.bf16.mxu1 %v3686_v46 }
 0x4a5   :  { %3194 = vmatmul.mubr.msk.bf16.vlgmr.msra.gmra.mrb[24].mxu0 %vm1720_vm3, %v4524_v40  ;;  %3196 = vmatmul.mubr.msk.bf16.vlgmr.msra.gmra.mrb[36].mxu1 %vm1720_vm3, %v4524_v40 }
 0x4a6   :  { %2436 = vmatpush1.bf16.msra.mxu0 %v3681_v50  ;;  %2479 = vmatpush1.bf16.msra.mxu1 %v3684_v51  ;;  %v1959_v50 = vld [vmem:[%s4790_s11 + $0x8] sm:$0xff] }
 0x4a7   :  { %3197 = vmatprep.subr.msk.bf16.mxu0 %vm1724_vm2, %v3179_v54  ;;  %3199 = vmatprep.subr.msk.bf16.mxu1 %vm1724_vm2, %v3181_v55 }
 0x4a8   :  { %2467 = vmatprep.mubr.bf16.mxu0 %v3791_v23  ;;  %2510 = vmatprep.mubr.bf16.mxu1 %v3791_v23 }
 0x4aa   :  { %2438 = vmatpush1.bf16.msra.mxu0 %v2231_v56  ;;  %2481 = vmatpush1.bf16.msra.mxu1 %v2237_v57 }
 0x4ab   :  { %2521 = vmatprep.subr.bf16.mxu0 %v3693_v58  ;;  %2564 = vmatprep.subr.bf16.mxu1 %v3696_v59  ;;  %v4649_v58 = vrot.slane %v1959_v50, %v4626_v17  ;;  %v4652_v59 = vrot.slane %v1959_v50, %v4629_v18 }
 0x4ad   :  { %3198 = vmatmul.mubr.msk.bf16.vlgmr.msra.gmra.mrb[28].mxu0 %vm1720_vm3, %v4524_v40  ;;  %3200 = vmatmul.mubr.msk.bf16.vlgmr.msra.gmra.mrb[40].mxu1 %vm1720_vm3, %v4524_v40 }
 0x4ae   :  { %2522 = vmatpush1.bf16.msra.mxu0 %v3691_v62  ;;  %2565 = vmatpush1.bf16.msra.mxu1 %v3694_v63  ;;  %v4655_v63 = vrot.slane %v1959_v50, %v4635_v19 }
 0x4af   :  { %3201 = vmatprep.subr.msk.bf16.mxu0 %vm1724_vm2, %v3183_v0  ;;  %3203 = vmatprep.subr.msk.bf16.mxu1 %vm1724_vm2, %v3185_v2  ;;  %v4657_v0 = vrot.slane %v1959_v50, %v1978_v20 }
 0x4b0   :  { %2553 = vmatprep.mubr.bf16.mxu0 %v3791_v23  ;;  %2596 = vmatprep.mubr.bf16.mxu1 %v3791_v23 }
 0x4b2   :  { %2524 = vmatpush1.bf16.msra.mxu0 %v2243_v4  ;;  %2567 = vmatpush1.bf16.msra.mxu1 %v2249_v5  ;;  %v4659_v5 = vrot.slane %v1959_v50, %v1982_v31 }
 0x4b3   :  { %2607 = vmatprep.subr.bf16.mxu0 %v3703_v6  ;;  %3496 = vmatprep.subr.bf16.mxu1 %v3788_v47 }
 0x4b5   :  { %3202 = vmatmul.mubr.msk.bf16.vlgmr.msra.gmra.mrb[32].mxu0 %vm1720_vm3, %v4524_v40  ;;  %3204 = vmatmul.mubr.msk.bf16.vlgmr.msra.gmra.mrb[44].mxu1 %vm1720_vm3, %v4524_v40 }
 0x4b6   :  { %2608 = vmatpush1.bf16.msra.mxu0 %v3701_v8  ;;  %3497 = vmatpush3.bf16.msra.mxu1 %v3704_v9 }
 0x4b7   :  { %3205 = vmatprep.subr.msk.bf16.mxu0 %vm1724_vm2, %v3187_v10  ;;  %3498 = vmatprep.subr.bf16.mxu1 %v3788_v47  ;;  %v4661_v10 = vrot.slane %v1959_v50, %v1990_v32 }
 0x4b8   :  { %2639 = vmatprep.mubr.bf16.mxu0 %v3791_v23  ;;  %3500 = vmatprep.mubr.msk.bf16.mxu1 %vm3789_vm0, %v3788_v47  ;;  %v1958_v47 = vld [vmem:[%s4790_s11] sm:$0xff] }
 0x4b9   :  { %v1967_v21 = vrot.slane %v1958_v47, %v4626_v17  ;;  %v1975_v22 = vrot.slane %v1958_v47, %v4629_v18  ;;  %v1971_v23 = vrot.slane %v1958_v47, %v4635_v19  ;;  %v1979_v24 = vrot.slane %v1958_v47, %v1978_v20 }
 0x4ba   :  { %2610 = vmatpush1.bf16.msra.mxu0 %v2255_v13  ;;  %3499 = vmatpush3.bf16.msra.mxu1 %v2261_v14  ;;  %v1983_v52 = vrot.slane %v1958_v47, %v1982_v31  ;;  %v1991_v53 = vrot.slane %v1958_v47, %v1990_v32  ;;  %v1987_v55 = vrot.slane %v1958_v47, %v1986_v37 }
 0x4bb   :  { %v1995_v56 = vrot.slane %v1958_v47, %v1994_v38 }
 0x4bd   :  { %3206 = vmatmul.mubr.msk.bf16.vlgmr.msra.gmra.mrb[36].mxu0 %vm1720_vm3, %v4524_v40  ;;  %3501 = vmatmul.mubr.msk.bf16.vlgmr.msra.gmra.mrb[48].mxu1 %vm1720_vm3, %v4524_v40 }
 0x570   :  { %v2297_v25 = vpop.f32.mrb[20].mxu0  ;;  %v2340_v26 = vpop.f32.mrb[32].mxu1 }
 0x571   :  { %v2298_v27 = vadd.f32 %v2297_v25, %v1967_v21  ;;  %v2341_v28 = vadd.f32 %v2340_v26, %v1975_v22  ;;  %v2299_v29 = vpop.f32.mrb[21].mxu0  ;;  %v2342_v30 = vpop.f32.mrb[33].mxu1  ;;  %v4666_v26 = vrot.slane %v1959_v50, %v1986_v37 }
 0x572   :  { %v2300_v33 = vadd.f32 %v2299_v29, %v1971_v23  ;;  %v2343_v34 = vadd.f32 %v2342_v30, %v1979_v24  ;;  %v2301_v35 = vpop.f32.mrb[22].mxu0  ;;  %v2344_v36 = vpop.f32.mrb[34].mxu1 }
 0x573   :  { %v2691_v39 = vmul.f32 0.5, %v2298_v27  ;;  %v2693_v40 = vmul.f32 0.5, %v2341_v28  ;;  %v2302_v41 = vadd.f32 %v2301_v35, %v1967_v21  ;;  %v2345_v42 = vadd.f32 %v2344_v36, %v1975_v22  ;;  %v2303_v43 = vpop.f32.mrb[23].mxu0  ;;  %v2346_v44 = vpop.f32.mrb[35].mxu1  ;;  %v1960_v21 = vld [vmem:[%s4790_s11 + $0x10] sm:$0x7] }
 0x574   :  { %v2692_v45 = vmul.f32 0.5, %v2300_v33  ;;  %v2694_v46 = vmul.f32 0.5, %v2343_v34  ;;  %v2304_v48 = vadd.f32 %v2303_v43, %v1971_v23  ;;  %v2347_v49 = vadd.f32 %v2346_v44, %v1979_v24 }
 0x575   :  { %3712 = vtanh.f32 %v2691_v39  ;;  %v2710_v51 = vmul.f32 0.5, %v2302_v41  ;;  %v2712_v54 = vmul.f32 0.5, %v2345_v42  ;;  %v4668_v27 = vrot.slane %v1959_v50, %v1994_v38 }
 0x576   :  { %3714 = vtanh.f32 %v2693_v40  ;;  %v2711_v57 = vmul.f32 0.5, %v2304_v48  ;;  %v2713_v60 = vmul.f32 0.5, %v2347_v49  ;;  %v4671_v30 = vrot.slane %v1960_v21, %v4626_v17 }
 0x577   :  { %3716 = vtanh.f32 %v2692_v45  ;;  %v4674_v31 = vrot.slane %v1960_v21, %v4629_v18  ;;  %v4677_v37 = vrot.slane %v1960_v21, %v4635_v19 }
 0x578   :  { %3718 = vtanh.f32 %v2694_v46  ;;  %v2383_v61 = vpop.f32.mrb[24].mxu0  ;;  %v2426_v62 = vpop.f32.mrb[36].mxu1 }
 0x579   :  { %3720 = vtanh.f32 %v2710_v51  ;;  %v2384_v1 = vadd.f32 %v2383_v61, %v1983_v52  ;;  %v2427_v2 = vadd.f32 %v2426_v62, %v1991_v53  ;;  %v2385_v3 = vpop.f32.mrb[25].mxu0  ;;  %v2428_v4 = vpop.f32.mrb[37].mxu1 }
 0x57a   :  { %3722 = vtanh.f32 %v2712_v54  ;;  %v2386_v6 = vadd.f32 %v2385_v3, %v1987_v55  ;;  %v2429_v7 = vadd.f32 %v2428_v4, %v1995_v56  ;;  %v2387_v8 = vpop.f32.mrb[26].mxu0  ;;  %v2430_v9 = vpop.f32.mrb[38].mxu1 }
 0x57b   :  { %3724 = vtanh.f32 %v2711_v57  ;;  %v2695_v11 = vmul.f32 0.5, %v2384_v1  ;;  %v2697_v12 = vmul.f32 0.5, %v2427_v2  ;;  %v2388_v13 = vadd.f32 %v2387_v8, %v1983_v52  ;;  %v2389_v14 = vpop.f32.mrb[27].mxu0  ;;  %v2432_v15 = vpop.f32.mrb[39].mxu1 }
 0x57c   :  { %3726 = vtanh.f32 %v2713_v60  ;;  %v2696_v16 = vmul.f32 0.5, %v2386_v6  ;;  %v2698_v47 = vmul.f32 0.5, %v2429_v7  ;;  %v2431_v20 = vadd.f32 %v2430_v9, %v1991_v53 }
 0x57d   :  { %3728 = vtanh.f32 %v2695_v11  ;;  %v2714_v22 = vmul.f32 0.5, %v2388_v13  ;;  %v2390_v23 = vadd.f32 %v2389_v14, %v1987_v55  ;;  %v2433_v24 = vadd.f32 %v2432_v15, %v1995_v56 }
 0x57e   :  { %3730 = vtanh.f32 %v2697_v12  ;;  %v2716_v25 = vmul.f32 0.5, %v2431_v20 }
 0x57f   :  { %v3713_v28 = vpop.eup %3712  ;;  %3732 = vtanh.f32 %v2696_v16  ;;  %v2715_v29 = vmul.f32 0.5, %v2390_v23  ;;  %v2717_v34 = vmul.f32 0.5, %v2433_v24 }
 0x580   :  { %v3715_v32 = vpop.eup %3714  ;;  %v2767_v33 = vadd.f32 1.0, %v3713_v28  ;;  %3734 = vtanh.f32 %v2698_v47  ;;  %v2469_v35 = vpop.f32.mrb[28].mxu0 }
 0x581   :  { %v2512_v36 = vpop.f32.mrb[40].mxu1  ;;  %v3717_v38 = vpop.eup %3716  ;;  %v2769_v39 = vadd.f32 1.0, %v3715_v32  ;;  %3736 = vtanh.f32 %v2714_v22  ;;  %v2470_v40 = vadd.f32 %v2469_v35, %v4649_v58 }
 0x582   :  { %v2513_v17 = vadd.f32 %v2512_v36, %v4652_v59  ;;  %v2471_v41 = vpop.f32.mrb[29].mxu0  ;;  %v2514_v42 = vpop.f32.mrb[41].mxu1  ;;  %v2805_v43 = vmul.f32 0.5, %v2767_v33  ;;  %v2768_v44 = vadd.f32 1.0, %v3717_v38  ;;  %3738 = vtanh.f32 %v2716_v25 }
 0x583   :  { %v3719_v18 = vpop.eup %3718  ;;  %v2472_v45 = vadd.f32 %v2471_v41, %v4655_v63  ;;  %v2473_v46 = vpop.f32.mrb[30].mxu0  ;;  %v2807_v19 = vmul.f32 0.5, %v2769_v39  ;;  %3740 = vtanh.f32 %v2715_v29  ;;  %v2699_v51 = vmul.f32 0.5, %v2470_v40 }
 0x584   :  { %v2516_v48 = vpop.f32.mrb[42].mxu1  ;;  %v3721_v49 = vpop.eup %3720  ;;  %v2770_v50 = vadd.f32 1.0, %v3719_v18  ;;  %v2806_v55 = vmul.f32 0.5, %v2768_v44  ;;  %3742 = vtanh.f32 %v2717_v34  ;;  %v2701_v57 = vmul.f32 0.5, %v2513_v17 }
 0x585   :  { %v2475_v52 = vpop.f32.mrb[31].mxu0  ;;  %v4682_v53 = vpop.f32.mrb[43].mxu1  ;;  %v2786_v56 = vadd.f32 1.0, %v3721_v49  ;;  %3744 = vtanh.f32 %v2699_v51  ;;  %v2700_v1 = vmul.f32 0.5, %v2472_v45  ;;  %v2515_v15 = vadd.f32 %v2514_v42, %v4657_v0 }
 0x586   :  { %v3723_v54 = vpop.eup %3722  ;;  %v2808_v61 = vmul.f32 0.5, %v2770_v50  ;;  %v3228_v3 = vpack.c.bf16 %v2806_v55, %v2805_v43  ;;  %3746 = vtanh.f32 %v2701_v57  ;;  %v2474_v16 = vadd.f32 %v2473_v46, %v4649_v58 }
 0x587   :  { %v3725_v60 = vpop.eup %3724  ;;  %v2788_v62 = vadd.f32 1.0, %v3723_v54  ;;  %v2824_v4 = vmul.f32 0.5, %v2786_v56  ;;  %3748 = vtanh.f32 %v2700_v1  ;;  %v2517_v24 = vadd.f32 %v2516_v48, %v4652_v59 }
 0x588   :  { %v3727_v2 = vpop.eup %3726  ;;  %v2787_v6 = vadd.f32 1.0, %v3725_v60  ;;  %v3229_v8 = vpack.c.bf16 %v2808_v61, %v2807_v19  ;;  %2959 = vst [vmem:[%s4791_s12] sm:$0xff] %v3228_v3  ;;  %v2555_v47 = vpop.f32.mrb[32].mxu0  ;;  %v2476_v25 = vadd.f32 %v2475_v52, %v4655_v63  ;;  %v2702_v35 = vmul.f32 0.5, %v2515_v15 }
 0x589   :  { %v3729_v7 = vpop.eup %3728  ;;  %v2826_v9 = vmul.f32 0.5, %v2788_v62  ;;  %v2789_v11 = vadd.f32 1.0, %v3727_v2  ;;  %v2598_v20 = vpop.f32.mrb[44].mxu1  ;;  %v2718_v42 = vmul.f32 0.5, %v2474_v16  ;;  %v2720_v45 = vmul.f32 0.5, %v2517_v24 }
 0x58a   :  { %v3731_v12 = vpop.eup %3730  ;;  %v2825_v13 = vmul.f32 0.5, %v2787_v6  ;;  %v2771_v14 = vadd.f32 1.0, %v3729_v7  ;;  %2960 = vst [vmem:[%s4791_s12 + $0x8] sm:$0xff] %v3229_v8  ;;  %v2557_v28 = vpop.f32.mrb[33].mxu0  ;;  %3750 = vtanh.f32 %v2702_v35  ;;  %v2719_v19 = vmul.f32 0.5, %v2476_v25 }
 0x58b   :  { %v3733_v21 = vpop.eup %3732  ;;  %v2827_v22 = vmul.f32 0.5, %v2789_v11  ;;  %v2773_v23 = vadd.f32 1.0, %v3731_v12  ;;  %v4694_v29 = vpop.f32.mrb[45].mxu1  ;;  %3752 = vtanh.f32 %v2718_v42  ;;  %v2519_v2 = vadd.f32 %v4682_v53, %v4657_v0 }
 0x58c   :  { %v3735_v32 = vpop.eup %3734  ;;  %v3238_v33 = vpack.c.bf16 %v2825_v13, %v2824_v4  ;;  %v2809_v34 = vmul.f32 0.5, %v2771_v14  ;;  %v2772_v58 = vadd.f32 1.0, %v3733_v21  ;;  %v4696_v36 = vpop.f32.mrb[34].mxu0  ;;  %3754 = vtanh.f32 %v2720_v45 }
 0x58d   :  { %v4698_v38 = vpop.f32.mrb[46].mxu1  ;;  %v3737_v39 = vpop.eup %3736  ;;  %v3239_v40 = vpack.c.bf16 %v2827_v22, %v2826_v9  ;;  %v2811_v17 = vmul.f32 0.5, %v2773_v23  ;;  %v2774_v41 = vadd.f32 1.0, %v3735_v32  ;;  %3756 = vtanh.f32 %v2719_v19 }
 0x58e   :  { %v2561_v59 = vpop.f32.mrb[35].mxu0  ;;  %v4700_v18 = vpop.f32.mrb[47].mxu1  ;;  %2970 = vst [vmem:[%s4791_s12 + $0x4c] sm:$0xff] %v3238_v33  ;;  %v2810_v43 = vmul.f32 0.5, %v2772_v58  ;;  %v2790_v44 = vadd.f32 1.0, %v3737_v39  ;;  %v2556_v3 = vadd.f32 %v2555_v47, %v4659_v5  ;;  %v2599_v11 = vadd.f32 %v2598_v20, %v4661_v10 }
 0x58f   :  { %v3739_v63 = vpop.eup %3738  ;;  %2971 = vst [vmem:[%s4791_s12 + $0x54] sm:$0xff] %v3239_v40  ;;  %v2812_v48 = vmul.f32 0.5, %v2774_v41  ;;  %v2558_v12 = vadd.f32 %v2557_v28, %v4666_v26  ;;  %v2721_v53 = vmul.f32 0.5, %v2519_v2  ;;  %v2560_v58 = vadd.f32 %v4696_v36, %v4659_v5 }
 0x590   :  { %v3741_v46 = vpop.eup %3740  ;;  %v2792_v49 = vadd.f32 1.0, %v3739_v63  ;;  %v3230_v51 = vpack.c.bf16 %v2810_v43, %v2809_v34  ;;  %v2828_v52 = vmul.f32 0.5, %v2790_v44  ;;  %v2641_v4 = vpop.f32.mrb[36].mxu0  ;;  %v2703_v24 = vmul.f32 0.5, %v2556_v3 }
 0x591   :  { %v3743_v50 = vpop.eup %3742  ;;  %v2791_v54 = vadd.f32 1.0, %v3741_v46  ;;  %v3231_v56 = vpack.c.bf16 %v2812_v48, %v2811_v17  ;;  %v2684_v6 = vpop.f32.mrb[48].mxu1  ;;  %v2705_v25 = vmul.f32 0.5, %v2599_v11  ;;  %3758 = vtanh.f32 %v2721_v53 }
 0x592   :  { %v3745_v55 = vpop.eup %3744  ;;  %v2830_v57 = vmul.f32 0.5, %v2792_v49  ;;  %v2793_v60 = vadd.f32 1.0, %v3743_v50  ;;  %2961 = vst [vmem:[%s4791_s12 + $0x10] sm:$0xff] %v3230_v51  ;;  %v2643_v13 = vpop.f32.mrb[37].mxu0  ;;  %v2704_v28 = vmul.f32 0.5, %v2558_v12  ;;  %v2601_v34 = vadd.f32 %v4694_v29, %v4668_v27 }
 0x593   :  { %v3747_v61 = vpop.eup %3746  ;;  %v2829_v62 = vmul.f32 0.5, %v2791_v54  ;;  %v2775_v1 = vadd.f32 1.0, %v3745_v55  ;;  %2962 = vst [vmem:[%s4791_s12 + $0x18] sm:$0xff] %v3231_v56  ;;  %v3502_v14 = vpop.f32.mrb[49].mxu1  ;;  %3760 = vtanh.f32 %v2703_v24  ;;  %v2603_v35 = vadd.f32 %v4698_v38, %v4661_v10 }
 0x594   :  { %v3749_v7 = vpop.eup %3748  ;;  %v2831_v8 = vmul.f32 0.5, %v2793_v60  ;;  %v2777_v9 = vadd.f32 1.0, %v3747_v61  ;;  %v2645_v47 = vpop.f32.mrb[38].mxu0  ;;  %v2562_v39 = vadd.f32 %v2561_v59, %v4666_v26  ;;  %3762 = vtanh.f32 %v2705_v25 }
 0x595   :  { %v3240_v15 = vpack.c.bf16 %v2829_v62, %v2828_v52  ;;  %v2813_v16 = vmul.f32 0.5, %v2775_v1  ;;  %v2776_v0 = vadd.f32 1.0, %v3749_v7  ;;  %v2687_v21 = vpop.f32.mrb[50].mxu1  ;;  %v2647_v32 = vpop.f32.mrb[39].mxu0  ;;  %v2706_v41 = vmul.f32 0.5, %v2601_v34 }
 0x596   :  { %v3241_v22 = vpack.c.bf16 %v2831_v8, %v2830_v57  ;;  %v2815_v23 = vmul.f32 0.5, %v2777_v9  ;;  %v3503_v33 = vpop.f32.mrb[51].mxu1  ;;  %v3751_v40 = vpop.eup %3750  ;;  %v2605_v29 = vadd.f32 %v4700_v18, %v4668_v27  ;;  %3764 = vtanh.f32 %v2704_v28 }
 0x597   :  { %2972 = vst [vmem:[%s4791_s12 + $0x5c] sm:$0xff] %v3240_v15  ;;  %v2814_v20 = vmul.f32 0.5, %v2776_v0  ;;  %v3753_v42 = vpop.eup %3752  ;;  %v2778_v63 = vadd.f32 1.0, %v3751_v40  ;;  %v2722_v43 = vmul.f32 0.5, %v2560_v58  ;;  %v2724_v44 = vmul.f32 0.5, %v2603_v35 }
 0x598   :  { %2973 = vst [vmem:[%s4791_s12 + $0x64] sm:$0xff] %v3241_v22  ;;  %v3755_v45 = vpop.eup %3754  ;;  %v2794_v5 = vadd.f32 1.0, %v3753_v42  ;;  %3766 = vtanh.f32 %v2706_v41  ;;  %v2723_v10 = vmul.f32 0.5, %v2562_v39  ;;  %v2725_v26 = vmul.f32 0.5, %v2605_v29 }
 0x599   :  { %v3232_v17 = vpack.c.bf16 %v2814_v20, %v2813_v16  ;;  %v3757_v36 = vpop.eup %3756  ;;  %v2816_v38 = vmul.f32 0.5, %v2778_v63  ;;  %v2796_v59 = vadd.f32 1.0, %v3755_v45  ;;  %3768 = vtanh.f32 %v2722_v43 }
 0x59a   :  { %v2642_v27 = vadd.f32 %v2641_v4, %v4671_v30  ;;  %v2832_v18 = vmul.f32 0.5, %v2794_v5  ;;  %v2795_v46 = vadd.f32 1.0, %v3757_v36  ;;  %3770 = vtanh.f32 %v2724_v44 }
 0x59b   :  { %2963 = vst [vmem:[%s4791_s12 + $0x20] sm:$0xff] %v3232_v17  ;;  %v2685_v48 = vadd.f32 %v2684_v6, %v4674_v31  ;;  %v3233_v49 = vpack.c.bf16 %v2816_v38, %v2815_v23  ;;  %3772 = vtanh.f32 %v2723_v10  ;;  %v2644_v52 = vadd.f32 %v2643_v13, %v4677_v37  ;;  %v3759_v57 = vpop.eup %3758 }
 0x59c   :  { %v2707_v19 = vmul.f32 0.5, %v2642_v27  ;;  %v2833_v50 = vmul.f32 0.5, %v2795_v46  ;;  %3774 = vtanh.f32 %v2725_v26  ;;  %v2646_v54 = vadd.f32 %v2645_v47, %v4671_v30 }
 0x59d   :  { %v2709_v51 = vmul.f32 0.5, %v2685_v48  ;;  %2964 = vst [vmem:[%s4791_s12 + $0x28] sm:$0xff] %v3233_v49  ;;  %v2688_v55 = vadd.f32 %v2687_v21, %v4674_v31  ;;  %v2648_v56 = vadd.f32 %v2647_v32, %v4677_v37  ;;  %v2834_v60 = vmul.f32 0.5, %v2796_v59  ;;  %v3761_v1 = vpop.eup %3760 }
 0x59e   :  { %3776 = vtanh.f32 %v2707_v19  ;;  %v3242_v61 = vpack.c.bf16 %v2833_v50, %v2832_v18  ;;  %v2708_v62 = vmul.f32 0.5, %v2644_v52  ;;  %v2797_v2 = vadd.f32 1.0, %v3759_v57  ;;  %v3763_v7 = vpop.eup %3762 }
 0x59f   :  { %3778 = vtanh.f32 %v2709_v51  ;;  %v2726_v3 = vmul.f32 0.5, %v2646_v54  ;;  %v2728_v4 = vmul.f32 0.5, %v2688_v55  ;;  %v2727_v6 = vmul.f32 0.5, %v2648_v56 }
 0x5a0   :  { %2974 = vst [vmem:[%s4791_s12 + $0x6c] sm:$0xff] %v3242_v61  ;;  %v2779_v30 = vadd.f32 1.0, %v3761_v1  ;;  %3780 = vtanh.f32 %v2708_v62  ;;  %v3765_v31 = vpop.eup %3764  ;;  %v2835_v8 = vmul.f32 0.5, %v2797_v2  ;;  %v2781_v37 = vadd.f32 1.0, %v3763_v7 }
 0x5a1   :  { %3782 = vtanh.f32 %v2726_v3  ;;  %v2780_v12 = vadd.f32 1.0, %v3765_v31 }
 0x5a2   :  { %v3767_v9 = vpop.eup %3766  ;;  %v2817_v11 = vmul.f32 0.5, %v2779_v30  ;;  %3784 = vtanh.f32 %v2728_v4  ;;  %v3243_v14 = vpack.c.bf16 %v2835_v8, %v2834_v60  ;;  %v2819_v15 = vmul.f32 0.5, %v2781_v37 }
 0x5a3   :  { %v3769_v13 = vpop.eup %3768  ;;  %v2782_v16 = vadd.f32 1.0, %v3767_v9  ;;  %3786 = vtanh.f32 %v2727_v6  ;;  %v2818_v53 = vmul.f32 0.5, %v2780_v12 }
 0x5a4   :  { %v3771_v0 = vpop.eup %3770  ;;  %v2798_v47 = vadd.f32 1.0, %v3769_v13  ;;  %2975 = vst [vmem:[%s4791_s12 + $0x74] sm:$0xff] %v3243_v14 }
 0x5a5   :  { %v3773_v21 = vpop.eup %3772  ;;  %v2820_v22 = vmul.f32 0.5, %v2782_v16  ;;  %v2800_v23 = vadd.f32 1.0, %v3771_v0  ;;  %v3234_v25 = vpack.c.bf16 %v2818_v53, %v2817_v11 }
 0x5a6   :  { %v3775_v24 = vpop.eup %3774  ;;  %v2836_v32 = vmul.f32 0.5, %v2798_v47  ;;  %v2799_v33 = vadd.f32 1.0, %v3773_v21 }
 0x5a7   :  { %v3235_v28 = vpack.c.bf16 %v2820_v22, %v2819_v15  ;;  %v2838_v34 = vmul.f32 0.5, %v2800_v23  ;;  %v2801_v58 = vadd.f32 1.0, %v3775_v24  ;;  %2965 = vst [vmem:[%s4791_s12 + $0x30] sm:$0xff] %v3234_v25 }
 0x5a8   :  { %v3777_v20 = vpop.eup %3776  ;;  %v2837_v39 = vmul.f32 0.5, %v2799_v33 }
 0x5a9   :  { %v3779_v35 = vpop.eup %3778  ;;  %v2783_v40 = vadd.f32 1.0, %v3777_v20  ;;  %2966 = vst [vmem:[%s4791_s12 + $0x38] sm:$0xff] %v3235_v28  ;;  %v2839_v17 = vmul.f32 0.5, %v2801_v58 }
 0x5aa   :  { %v2785_v41 = vadd.f32 1.0, %v3779_v35  ;;  %v3781_v29 = vpop.eup %3780  ;;  %v3244_v42 = vpack.c.bf16 %v2837_v39, %v2836_v32 }
 0x5ab   :  { %v3783_v63 = vpop.eup %3782  ;;  %v3245_v43 = vpack.c.bf16 %v2839_v17, %v2838_v34  ;;  %v2821_v44 = vmul.f32 0.5, %v2783_v40  ;;  %v2784_v5 = vadd.f32 1.0, %v3781_v29 }
 0x5ac   :  { %v2823_v45 = vmul.f32 0.5, %v2785_v41  ;;  %v3785_v10 = vpop.eup %3784  ;;  %2976 = vst [vmem:[%s4791_s12 + $0x7c] sm:$0xff] %v3244_v42  ;;  %v2802_v26 = vadd.f32 1.0, %v3783_v63 }
 0x5ad   :  { %v3787_v36 = vpop.eup %3786  ;;  %2977 = vst [vmem:[%s4791_s12 + $0x84] sm:$0xff] %v3245_v43  ;;  %v2822_v59 = vmul.f32 0.5, %v2784_v5  ;;  %v2804_v27 = vadd.f32 1.0, %v3785_v10 }
 0x5ae   :  { %v3237_v38 = vpack.c.bf16 %v2823_v45, %v2823_v45  ;;  %v2840_v18 = vmul.f32 0.5, %v2802_v26  ;;  %v2803_v46 = vadd.f32 1.0, %v3787_v36 }
 0x5af   :  { %v3236_v48 = vpack.c.bf16 %v2822_v59, %v2821_v44  ;;  %v2842_v49 = vmul.f32 0.5, %v2804_v27 }
 0x5b0   :  { %2969 = vst.msk [vmem:[%s4791_s12 + $0x48] sm:$0xf] %vm2968_vm4, %v3237_v38  ;;  %v2841_v19 = vmul.f32 0.5, %v2803_v46 }
 0x5b1   :  { %2967 = vst [vmem:[%s4791_s12 + $0x40] sm:$0xff] %v3236_v48  ;;  %v3247_v50 = vpack.c.bf16 %v2842_v49, %v2842_v49 }
 0x5b2   :  { %v3246_v51 = vpack.c.bf16 %v2841_v19, %v2840_v18 }
 0x5b3   :  { %2979 = vst.msk [vmem:[%s4791_s12 + $0x94] sm:$0xf] %vm2968_vm4, %v3247_v50 }
 0x5b4   :  { %2978 = vst [vmem:[%s4791_s12 + $0x8c] sm:$0xff] %v3246_v51 }

</bundles_post_ra>
